<compile_context>
chip_gen: v7x
topology: tpu7x:2x2x1
jax: 0.10.0
libtpu: 0.0.40
codegen_flags: <defaults>
</compile_context>

<pallas_src>
import functools
import math

import jax
import jax.numpy as jnp
import numpy as np
from jax import lax
from jax.experimental import pallas as pl
from jax.experimental.pallas import tpu as pltpu

EPS = 1e-12  # BERT layer_norm_eps


def _layernorm(y, gamma, beta, eps):
    mu = jnp.mean(y, axis=-1, keepdims=True)
    var = jnp.mean(jnp.square(y - mu), axis=-1, keepdims=True)
    return (y - mu) * lax.rsqrt(var + eps) * gamma + beta


# --------------------------- chip-specific knobs ----------------------------- #

def _device_kind():
    try:
        return jax.devices()[0].device_kind.lower()
    except Exception:
        return ""


def _exp_in_bf16():
    # bf16 EUP exists on v6e / v7x; keep softmax exp in f32 on v5e and older.
    kind = _device_kind()
    return ("v6" in kind) or ("v7" in kind)


def _vmem_limit_bytes():
    # ~52 MiB on v7x (64 MiB physical VMEM), up to 112 MiB on v5e/v6e (128 MiB).
    try:
        cap = pltpu.get_tpu_info().vmem_capacity_bytes
        return int(max(min(cap - 12 * 2**20, 112 * 2**20), 48 * 2**20))
    except Exception:
        return 48 * 1024 * 1024  # conservative, known-good fallback


def _pick_i_chunk(I, target=512):
    """Largest 128-multiple <= target that divides I (or I itself)."""
    if I <= target:
        return I
    c = (target // 128) * 128
    while c >= 128:
        if I % c == 0:
            return c
        c -= 128
    return I


# ------------------------------ Pallas kernel ------------------------------- #

def bert_layer_kernel(x_ref, mask_ref,
                      wq_ref, bq_ref, wk_ref, bk_ref, wv_ref, bv_ref,
                      wo_ref, bo_ref, g1_ref, b1_ref,
                      wi_ref, bi_ref, wo2_ref, bo2_ref, g2_ref, b2_ref,
                      *rest, num_heads, head_dim, eps, has_noise, exp_bf16):
    """One fused BertLayerDenoised step: grid=(B, I_chunks).

    Chunk 0 computes attention + LN1 into scratch; every chunk adds its slice
    of the FFN; the last chunk applies noise, the residual and LN2.
    """
    if has_noise:
        (noise_ref, o_ref,
         qh_ref, kh_ref, vh_ref, ctx_ref, x1_ref, h2_ref) = rest
    else:
        noise_ref = None
        (o_ref, qh_ref, kh_ref, vh_ref, ctx_ref, x1_ref, h2_ref) = rest

    c = pl.program_id(1)
    last_c = pl.num_programs(1) - 1
    S = x_ref.shape[1]

    # ---------------- attention + LN1 + accumulator init (chunk 0 only) ------ #
    @pl.when(c == 0)
    def _attention():
        x = x_ref[0].astype(jnp.float32)                     # (S, H)
        xb = x.astype(jnp.bfloat16)
        # Hoisted out of the head loop (no per-head broadcast_in_dim).
        mask_full = jnp.broadcast_to(mask_ref[0].astype(jnp.float32), (S, S))

        def mm(a_bf16, w_ref, b_ref):
            # bf16 x bf16 MXU matmul, f32 accumulation, f32 bias add.
            return (jnp.dot(a_bf16, w_ref[...],
                            preferred_element_type=jnp.float32)
                    + b_ref[...].astype(jnp.float32))

        scale = 1.0 / math.sqrt(head_dim)
        q = (mm(xb, wq_ref, bq_ref) * scale).astype(jnp.bfloat16)  # scale folded once
        k = mm(xb, wk_ref, bk_ref).astype(jnp.bfloat16)
        v = mm(xb, wv_ref, bv_ref).astype(jnp.bfloat16)

        # One-time relayout to head-major scratch so the attention loop only
        # uses (free, aligned) leading-axis indexing.
        for h in range(num_heads):
            sl = slice(h * head_dim, (h + 1) * head_dim)
            qh_ref[h] = q[:, sl]
            kh_ref[h] = k[:, sl]
            vh_ref[h] = v[:, sl]

        def head_body(h, carry):
            q_h = qh_ref[h]                                   # (S, hd) bf16
            k_h = kh_ref[h]
            v_h = vh_ref[h]
            s = lax.dot_general(q_h, k_h, (((1,), (1,)), ((), ())),
                                preferred_element_type=jnp.float32)  # (S, S)
            s = s + mask_full
            m = jnp.max(s, axis=-1, keepdims=True)
            if exp_bf16:
                e = jnp.exp((s - m).astype(jnp.bfloat16))      # bf16 EUP (v6e/v7x)
                denom = jnp.sum(e.astype(jnp.float32), axis=-1, keepdims=True)
            else:
                e = jnp.exp(s - m)                             # f32 (v5e)
                denom = jnp.sum(e, axis=-1, keepdims=True)
            inv = pl.reciprocal(denom, approx=True).astype(e.dtype)
            p = (e * inv).astype(jnp.bfloat16)
            ctx_ref[h] = jnp.dot(p, v_h,
                                 preferred_element_type=jnp.float32
                                 ).astype(jnp.bfloat16)        # (S, hd)
            return carry

        # fori_loop bounds live ranges: only one head's (S,S) temporaries alive.
        lax.fori_loop(0, num_heads, head_body, 0)

        # One full-width output projection (no per-head K=64 matmuls).
        ctx = jnp.concatenate([ctx_ref[h] for h in range(num_heads)], axis=-1)
        attn = (jnp.dot(ctx, wo_ref[...], preferred_element_type=jnp.float32)
                + bo_ref[...].astype(jnp.float32))

        # Attention residual + LayerNorm (dropout = identity in eval mode).
        x1_ref[...] = _layernorm(attn + x, g1_ref[...], b1_ref[...], eps)
        h2_ref[...] = jnp.zeros_like(h2_ref)

    # ---------------- FFN chunk (runs every grid step) ----------------------- #
    # wi_ref / bi_ref / wo2_ref hold the current I-chunk; the next chunk's DMA
    # is prefetched by the BlockSpec pipeline while this matmul runs.
    x1b = x1_ref[...].astype(jnp.bfloat16)
    hmid = jax.nn.gelu(
        jnp.dot(x1b, wi_ref[...], preferred_element_type=jnp.float32)
        + bi_ref[...].astype(jnp.float32),
        approximate=True)
    h2_ref[...] += jnp.dot(hmid.astype(jnp.bfloat16), wo2_ref[...],
                           preferred_element_type=jnp.float32)

    # ---------------- finalize (last chunk only) ------------------------------ #
    @pl.when(c == last_c)
    def _finalize():
        h2 = h2_ref[...] + bo2_ref[...].astype(jnp.float32)
        if has_noise:
            h2 = h2 * noise_ref[0].astype(jnp.float32)         # BertOutputDenoised
        o_ref[0] = _layernorm(h2 + x1_ref[...], g2_ref[...], b2_ref[...],
                              eps).astype(o_ref.dtype)


# -------------------------------- wrappers ---------------------------------- #

def bert_layer(x, p, mask3, noise_l, *, num_heads, head_dim, exp_bf16,
               vmem_limit, i_chunk_target=512):
    B, S, H = x.shape
    I = p["wi"].shape[1]
    has_noise = noise_l is not None
    i_chunk = _pick_i_chunk(I, i_chunk_target)
    num_chunks = I // i_chunk

    kern = functools.partial(bert_layer_kernel, num_heads=num_heads,
                             head_dim=head_dim, eps=EPS, has_noise=has_noise,
                             exp_bf16=exp_bf16)

    def _rep(shape):
        # Whole-array block, constant index map -> DMA'd once per layer call.
        return pl.BlockSpec(shape, lambda b, c, _n=len(shape): (0,) * _n)

    in_specs = [
        pl.BlockSpec((1, S, H), lambda b, c: (b, 0, 0)),          # x
        pl.BlockSpec((1, 1, S), lambda b, c: (b, 0, 0)),          # mask
        _rep((H, H)), _rep((1, H)),                               # wq, bq
        _rep((H, H)), _rep((1, H)),                               # wk, bk
        _rep((H, H)), _rep((1, H)),                               # wv, bv
        _rep((H, H)), _rep((1, H)),                               # wo, bo
        _rep((1, H)), _rep((1, H)),                               # ln1 gamma/beta
        pl.BlockSpec((H, i_chunk), lambda b, c: (0, c)),          # wi  (streamed)
        pl.BlockSpec((1, i_chunk), lambda b, c: (0, c)),          # bi  (streamed)
        pl.BlockSpec((i_chunk, H), lambda b, c: (c, 0)),          # wo2 (streamed)
        _rep((1, H)),                                             # bo2
        _rep((1, H)), _rep((1, H)),                               # ln2 gamma/beta
    ]
    args = [x, mask3, p["wq"], p["bq"], p["wk"], p["bk"], p["wv"], p["bv"],
            p["wo"], p["bo"], p["ln1_g"], p["ln1_b"],
            p["wi"], p["bi"], p["wo2"], p["bo2"], p["ln2_g"], p["ln2_b"]]
    if has_noise:
        in_specs.append(pl.BlockSpec((1, S, H), lambda b, c: (b, 0, 0)))  # noise
        args.append(noise_l)

    scratch_shapes = [
        pltpu.VMEM((num_heads, S, head_dim), jnp.bfloat16),   # q (head-major)
        pltpu.VMEM((num_heads, S, head_dim), jnp.bfloat16),   # k (head-major)
        pltpu.VMEM((num_heads, S, head_dim), jnp.bfloat16),   # v (head-major)
        pltpu.VMEM((num_heads, S, head_dim), jnp.bfloat16),   # per-head context
        pltpu.VMEM((S, H), jnp.float32),                      # x1 (post-LN1)
        pltpu.VMEM((S, H), jnp.float32),                      # FFN accumulator
    ]

    return pl.pallas_call(
        kern,
        out_shape=jax.ShapeDtypeStruct((B, S, H), x.dtype),
        grid=(B, num_chunks),
        in_specs=in_specs,
        out_specs=pl.BlockSpec((1, S, H), lambda b, c: (b, 0, 0)),
        scratch_shapes=scratch_shapes,
        compiler_params=pltpu.CompilerParams(
            dimension_semantics=("parallel", "arbitrary"),
            vmem_limit_bytes=vmem_limit,
        ),
    )(*args)


def bert_encoder_denoised(hidden_states, params, ext_mask, noise=None,
                          *, num_heads, head_dim):
    """Equivalent of BertEncoderDenoised.forward(...).last_hidden_state."""
    B, S, H = hidden_states.shape
    mask3 = ext_mask.reshape(B, 1, S).astype(jnp.float32)
    exp_bf16 = _exp_in_bf16()
    vmem_limit = _vmem_limit_bytes()
    x = hidden_states
    for i, p in enumerate(params):
        noise_i = noise[i + 1] if noise is not None else None  # skip DMA if None
        x = bert_layer(x, p, mask3, noise_i, num_heads=num_heads,
                       head_dim=head_dim, exp_bf16=exp_bf16,
                       vmem_limit=vmem_limit)
    return x


# --------------------------- pure-JAX reference ----------------------------- #
# Mirrors the kernel's mixed precision (bf16 MXU operands, f32 accumulation,
# f32 softmax / LayerNorm) so the comparison isolates kernel correctness.

def reference_encoder(hidden_states, params, ext_mask, noise, *, num_heads, head_dim):
    x = hidden_states
    B, S, H = x.shape

    def mm(a, w, b):
        return jnp.dot(a.astype(jnp.bfloat16), w,
                       preferred_element_type=jnp.float32) + b

    for i, p in enumerate(params):
        scale = 1.0 / math.sqrt(head_dim)
        q = (mm(x, p["wq"], p["bq"]) * scale).astype(jnp.bfloat16)
        k = mm(x, p["wk"], p["bk"]).astype(jnp.bfloat16)
        v = mm(x, p["wv"], p["bv"]).astype(jnp.bfloat16)

        def split(t):
            return t.reshape(B, S, num_heads, head_dim).transpose(0, 2, 1, 3)

        qh, kh, vh = split(q), split(k), split(v)
        scores = jnp.einsum("bhqd,bhkd->bhqk", qh, kh,
                            preferred_element_type=jnp.float32) + ext_mask
        probs = jax.nn.softmax(scores, axis=-1)
        ctx = jnp.einsum("bhqk,bhkd->bhqd", probs.astype(jnp.bfloat16), vh,
                         preferred_element_type=jnp.float32)
        ctx = ctx.transpose(0, 2, 1, 3).reshape(B, S, H)
        attn = jnp.dot(ctx.astype(jnp.bfloat16), p["wo"],
                       preferred_element_type=jnp.float32) + p["bo"]
        x1 = _layernorm(attn + x, p["ln1_g"], p["ln1_b"], EPS)

        h = jax.nn.gelu(mm(x1, p["wi"], p["bi"]), approximate=True)
        h = mm(h, p["wo2"], p["bo2"])
        if noise is not None:
            h = h * noise[i + 1]
        x = _layernorm(h + x1, p["ln2_g"], p["ln2_b"], EPS)
    return x


# ------------------------------ param init ---------------------------------- #

def init_params(key, num_layers, H, I):
    params = []
    s = 0.02
    for _ in range(num_layers):
        key, *ks = jax.random.split(key, 13)

        def w(k, shape):  # weights streamed as bf16
            return (jax.random.normal(k, shape, jnp.float32) * s).astype(jnp.bfloat16)

        def b(k, shape):  # biases / LN params stay f32
            return jax.random.normal(k, shape, jnp.float32) * s

        p = dict(
            wq=w(ks[0], (H, H)), bq=b(ks[1], (1, H)),
            wk=w(ks[2], (H, H)), bk=b(ks[3], (1, H)),
            wv=w(ks[4], (H, H)), bv=b(ks[5], (1, H)),
            wo=w(ks[6], (H, H)), bo=b(ks[7], (1, H)),
            ln1_g=jnp.ones((1, H), jnp.float32),
            ln1_b=jnp.zeros((1, H), jnp.float32),
            wi=w(ks[8], (H, I)), bi=b(ks[9], (1, I)),
            wo2=w(ks[10], (I, H)), bo2=b(ks[11], (1, H)),
            ln2_g=jnp.ones((1, H), jnp.float32),
            ln2_b=jnp.zeros((1, H), jnp.float32),
        )
        params.append(p)
    return params


if __name__ == "__main__":
    # Small synthetic BERT config: 2 layers, hidden=32, 4 heads, intermediate=64.
    B, S, H, I = 2, 8, 32, 64
    NUM_HEADS, HEAD_DIM = 4, 8
    NUM_LAYERS = 2

    key = jax.random.PRNGKey(0)
    k_params, k_x, k_n = jax.random.split(key, 3)

    params = init_params(k_params, NUM_LAYERS, H, I)
    hidden_states = jax.random.normal(k_x, (B, S, H), jnp.float32)
    # noise[i + 1] multiplies layer i's FFN output (BertOutputDenoised).
    noise = 1.0 + 0.1 * jax.random.normal(k_n, (NUM_LAYERS + 1, B, S, H), jnp.float32)

    # HF-style extended additive attention mask (B, 1, 1, S): mask last 2 tokens
    # of the second example.
    attn_mask_2d = jnp.ones((B, S), jnp.float32).at[1, -2:].set(0.0)
    ext_mask = (1.0 - attn_mask_2d)[:, None, None, :] * -10000.0

    # --- with noise ---
    out = bert_encoder_denoised(hidden_states, params, ext_mask, noise,
                                num_heads=NUM_HEADS, head_dim=HEAD_DIM)
    out = jax.block_until_ready(out)
    ref = reference_encoder(hidden_states, params, ext_mask, noise,
                            num_heads=NUM_HEADS, head_dim=HEAD_DIM)
    np.testing.assert_allclose(np.asarray(out), np.asarray(ref), rtol=2e-2, atol=2e-2)

    # --- without noise (separate kernel variant, no noise operand DMA'd) ---
    out_nn = bert_encoder_denoised(hidden_states, params, ext_mask, None,
                                   num_heads=NUM_HEADS, head_dim=HEAD_DIM)
    out_nn = jax.block_until_ready(out_nn)
    ref_nn = reference_encoder(hidden_states, params, ext_mask, None,
                               num_heads=NUM_HEADS, head_dim=HEAD_DIM)
    np.testing.assert_allclose(np.asarray(out_nn), np.asarray(ref_nn),
                               rtol=2e-2, atol=2e-2)

    print("KERNEL_OK")
</pallas_src>

<mosaic_0001>
module attributes {stable_mosaic.version = 11 : i64} {
  func.func @bert_layer_kernel(%arg0: i32, %arg1: i32, %arg2: memref<1x8x32xf32, #tpu.memory_space<vmem>>, %arg3: memref<1x1x8xf32, #tpu.memory_space<vmem>>, %arg4: memref<32x32xbf16, #tpu.memory_space<vmem>>, %arg5: memref<1x32xf32, #tpu.memory_space<vmem>>, %arg6: memref<32x32xbf16, #tpu.memory_space<vmem>>, %arg7: memref<1x32xf32, #tpu.memory_space<vmem>>, %arg8: memref<32x32xbf16, #tpu.memory_space<vmem>>, %arg9: memref<1x32xf32, #tpu.memory_space<vmem>>, %arg10: memref<32x32xbf16, #tpu.memory_space<vmem>>, %arg11: memref<1x32xf32, #tpu.memory_space<vmem>>, %arg12: memref<1x32xf32, #tpu.memory_space<vmem>>, %arg13: memref<1x32xf32, #tpu.memory_space<vmem>>, %arg14: memref<32x64xbf16, #tpu.memory_space<vmem>>, %arg15: memref<1x64xf32, #tpu.memory_space<vmem>>, %arg16: memref<64x32xbf16, #tpu.memory_space<vmem>>, %arg17: memref<1x32xf32, #tpu.memory_space<vmem>>, %arg18: memref<1x32xf32, #tpu.memory_space<vmem>>, %arg19: memref<1x32xf32, #tpu.memory_space<vmem>>, %arg20: memref<1x8x32xf32, #tpu.memory_space<vmem>>, %arg21: memref<1x8x32xf32, #tpu.memory_space<vmem>>, %arg22: memref<4x8x8xbf16, #tpu.memory_space<vmem>>, %arg23: memref<4x8x8xbf16, #tpu.memory_space<vmem>>, %arg24: memref<4x8x8xbf16, #tpu.memory_space<vmem>>, %arg25: memref<4x8x8xbf16, #tpu.memory_space<vmem>>, %arg26: memref<8x32xf32, #tpu.memory_space<vmem>>, %arg27: memref<8x32xf32, #tpu.memory_space<vmem>>) attributes {dimension_semantics = [#tpu.dimension_semantics<parallel>, #tpu.dimension_semantics<arbitrary>], iteration_bounds = array<i64: 2, 1>, scalar_prefetch = 0 : i64, scratch_operands = 6 : i64, tpu.core_type = #tpu.core_type<tc>, window_params = [{transform_indices = @transform_0, window_bounds = array<i64: 1, 8, 32>}, {transform_indices = @transform_1, window_bounds = array<i64: 1, 1, 8>}, {pipeline_mode = #tpu.pipeline_mode<synchronous>, transform_indices = @transform_2, window_bounds = array<i64: 32, 32>}, {pipeline_mode = #tpu.pipeline_mode<synchronous>, transform_indices = @transform_3, window_bounds = array<i64: 1, 32>}, {pipeline_mode = #tpu.pipeline_mode<synchronous>, transform_indices = @transform_4, window_bounds = array<i64: 32, 32>}, {pipeline_mode = #tpu.pipeline_mode<synchronous>, transform_indices = @transform_5, window_bounds = array<i64: 1, 32>}, {pipeline_mode = #tpu.pipeline_mode<synchronous>, transform_indices = @transform_6, window_bounds = array<i64: 32, 32>}, {pipeline_mode = #tpu.pipeline_mode<synchronous>, transform_indices = @transform_7, window_bounds = array<i64: 1, 32>}, {pipeline_mode = #tpu.pipeline_mode<synchronous>, transform_indices = @transform_8, window_bounds = array<i64: 32, 32>}, {pipeline_mode = #tpu.pipeline_mode<synchronous>, transform_indices = @transform_9, window_bounds = array<i64: 1, 32>}, {pipeline_mode = #tpu.pipeline_mode<synchronous>, transform_indices = @transform_10, window_bounds = array<i64: 1, 32>}, {pipeline_mode = #tpu.pipeline_mode<synchronous>, transform_indices = @transform_11, window_bounds = array<i64: 1, 32>}, {transform_indices = @transform_12, window_bounds = array<i64: 32, 64>}, {transform_indices = @transform_13, window_bounds = array<i64: 1, 64>}, {transform_indices = @transform_14, window_bounds = array<i64: 64, 32>}, {pipeline_mode = #tpu.pipeline_mode<synchronous>, transform_indices = @transform_15, window_bounds = array<i64: 1, 32>}, {pipeline_mode = #tpu.pipeline_mode<synchronous>, transform_indices = @transform_16, window_bounds = array<i64: 1, 32>}, {pipeline_mode = #tpu.pipeline_mode<synchronous>, transform_indices = @transform_17, window_bounds = array<i64: 1, 32>}, {transform_indices = @transform_18, window_bounds = array<i64: 1, 8, 32>}, {transform_indices = @transform_19, window_bounds = array<i64: 1, 8, 32>}]} {
    %c0_i32 = arith.constant 0 : i32
    %0 = arith.cmpi eq, %arg1, %c0_i32 : i32
    %1 = arith.extui %0 : i1 to i32
    %c0_i32_0 = arith.constant 0 : i32
    %2 = arith.cmpi ne, %1, %c0_i32_0 : i32
    scf.if %2 {
      %c0_19 = arith.constant 0 : index
      %c0_20 = arith.constant 0 : index
      %c0_21 = arith.constant 0 : index
      %32 = vector.load %arg2[%c0_19, %c0_20, %c0_21] : memref<1x8x32xf32, #tpu.memory_space<vmem>>, vector<1x8x32xf32>
      %33 = vector.shape_cast %32 : vector<1x8x32xf32> to vector<8x32xf32>
      %34 = arith.truncf %33 : vector<8x32xf32> to vector<8x32xbf16>
      %c0_22 = arith.constant 0 : index
      %c0_23 = arith.constant 0 : index
      %c0_24 = arith.constant 0 : index
      %35 = vector.load %arg3[%c0_22, %c0_23, %c0_24] : memref<1x1x8xf32, #tpu.memory_space<vmem>>, vector<1x1x8xf32>
      %36 = vector.shape_cast %35 : vector<1x1x8xf32> to vector<1x8xf32>
      %37 = vector.shape_cast %36 : vector<1x8xf32> to vector<1x8xf32>
      %38 = vector.broadcast %37 : vector<1x8xf32> to vector<8x8xf32>
      %c0_25 = arith.constant 0 : index
      %c0_26 = arith.constant 0 : index
      %39 = vector.load %arg4[%c0_25, %c0_26] : memref<32x32xbf16, #tpu.memory_space<vmem>>, vector<32x32xbf16>
      %cst_27 = arith.constant dense<0.000000e+00> : vector<8x32xf32>
      %40 = tpu.matmul %34, %39, %cst_27 {dimension_numbers = #tpu.dot_dimension_numbers<[1], [0], [0], [1], [0, 0, 1, 1], [], []>} : vector<8x32xbf16>, vector<32x32xbf16>, vector<8x32xf32> -> vector<8x32xf32>
      %c0_28 = arith.constant 0 : index
      %c0_29 = arith.constant 0 : index
      %41 = vector.load %arg5[%c0_28, %c0_29] : memref<1x32xf32, #tpu.memory_space<vmem>>, vector<1x32xf32>
      %42 = vector.broadcast %41 : vector<1x32xf32> to vector<8x32xf32>
      %43 = arith.addf %40, %42 : vector<8x32xf32>
      %cst_30 = arith.constant 0.353553385 : f32
      %44 = vector.broadcast %cst_30 : f32 to vector<8x32xf32>
      %45 = arith.mulf %43, %44 : vector<8x32xf32>
      %46 = arith.truncf %45 : vector<8x32xf32> to vector<8x32xbf16>
      %c0_31 = arith.constant 0 : index
      %c0_32 = arith.constant 0 : index
      %47 = vector.load %arg6[%c0_31, %c0_32] : memref<32x32xbf16, #tpu.memory_space<vmem>>, vector<32x32xbf16>
      %cst_33 = arith.constant dense<0.000000e+00> : vector<8x32xf32>
      %48 = tpu.matmul %34, %47, %cst_33 {dimension_numbers = #tpu.dot_dimension_numbers<[1], [0], [0], [1], [0, 0, 1, 1], [], []>} : vector<8x32xbf16>, vector<32x32xbf16>, vector<8x32xf32> -> vector<8x32xf32>
      %c0_34 = arith.constant 0 : index
      %c0_35 = arith.constant 0 : index
      %49 = vector.load %arg7[%c0_34, %c0_35] : memref<1x32xf32, #tpu.memory_space<vmem>>, vector<1x32xf32>
      %50 = vector.broadcast %49 : vector<1x32xf32> to vector<8x32xf32>
      %51 = arith.addf %48, %50 : vector<8x32xf32>
      %52 = arith.truncf %51 : vector<8x32xf32> to vector<8x32xbf16>
      %c0_36 = arith.constant 0 : index
      %c0_37 = arith.constant 0 : index
      %53 = vector.load %arg8[%c0_36, %c0_37] : memref<32x32xbf16, #tpu.memory_space<vmem>>, vector<32x32xbf16>
      %cst_38 = arith.constant dense<0.000000e+00> : vector<8x32xf32>
      %54 = tpu.matmul %34, %53, %cst_38 {dimension_numbers = #tpu.dot_dimension_numbers<[1], [0], [0], [1], [0, 0, 1, 1], [], []>} : vector<8x32xbf16>, vector<32x32xbf16>, vector<8x32xf32> -> vector<8x32xf32>
      %c0_39 = arith.constant 0 : index
      %c0_40 = arith.constant 0 : index
      %55 = vector.load %arg9[%c0_39, %c0_40] : memref<1x32xf32, #tpu.memory_space<vmem>>, vector<1x32xf32>
      %56 = vector.broadcast %55 : vector<1x32xf32> to vector<8x32xf32>
      %57 = arith.addf %54, %56 : vector<8x32xf32>
      %58 = arith.truncf %57 : vector<8x32xf32> to vector<8x32xbf16>
      %59 = vector.extract_strided_slice %46 {offsets = [0, 0], sizes = [8, 8], strides = [1, 1]} : vector<8x32xbf16> to vector<8x8xbf16>
      %c0_41 = arith.constant 0 : index
      %c0_42 = arith.constant 0 : index
      %c0_43 = arith.constant 0 : index
      %60 = vector.load %arg22[%c0_41, %c0_42, %c0_43] : memref<4x8x8xbf16, #tpu.memory_space<vmem>>, vector<1x8x8xbf16>
      %61 = vector.shape_cast %60 : vector<1x8x8xbf16> to vector<8x8xbf16>
      %62 = vector.shape_cast %59 : vector<8x8xbf16> to vector<1x8x8xbf16>
      tpu.vector_store %arg22[%c0_41, %c0_42, %c0_43], %62 {strides = array<i32>} : memref<4x8x8xbf16, #tpu.memory_space<vmem>>, vector<1x8x8xbf16>,
      %63 = vector.extract_strided_slice %52 {offsets = [0, 0], sizes = [8, 8], strides = [1, 1]} : vector<8x32xbf16> to vector<8x8xbf16>
      %c0_44 = arith.constant 0 : index
      %c0_45 = arith.constant 0 : index
      %c0_46 = arith.constant 0 : index
      %64 = vector.load %arg23[%c0_44, %c0_45, %c0_46] : memref<4x8x8xbf16, #tpu.memory_space<vmem>>, vector<1x8x8xbf16>
      %65 = vector.shape_cast %64 : vector<1x8x8xbf16> to vector<8x8xbf16>
      %66 = vector.shape_cast %63 : vector<8x8xbf16> to vector<1x8x8xbf16>
      tpu.vector_store %arg23[%c0_44, %c0_45, %c0_46], %66 {strides = array<i32>} : memref<4x8x8xbf16, #tpu.memory_space<vmem>>, vector<1x8x8xbf16>,
      %67 = vector.extract_strided_slice %58 {offsets = [0, 0], sizes = [8, 8], strides = [1, 1]} : vector<8x32xbf16> to vector<8x8xbf16>
      %c0_47 = arith.constant 0 : index
      %c0_48 = arith.constant 0 : index
      %c0_49 = arith.constant 0 : index
      %68 = vector.load %arg24[%c0_47, %c0_48, %c0_49] : memref<4x8x8xbf16, #tpu.memory_space<vmem>>, vector<1x8x8xbf16>
      %69 = vector.shape_cast %68 : vector<1x8x8xbf16> to vector<8x8xbf16>
      %70 = vector.shape_cast %67 : vector<8x8xbf16> to vector<1x8x8xbf16>
      tpu.vector_store %arg24[%c0_47, %c0_48, %c0_49], %70 {strides = array<i32>} : memref<4x8x8xbf16, #tpu.memory_space<vmem>>, vector<1x8x8xbf16>,
      %71 = vector.extract_strided_slice %46 {offsets = [0, 8], sizes = [8, 8], strides = [1, 1]} : vector<8x32xbf16> to vector<8x8xbf16>
      %c1 = arith.constant 1 : index
      %c0_50 = arith.constant 0 : index
      %c0_51 = arith.constant 0 : index
      %72 = vector.load %arg22[%c1, %c0_50, %c0_51] : memref<4x8x8xbf16, #tpu.memory_space<vmem>>, vector<1x8x8xbf16>
      %73 = vector.shape_cast %72 : vector<1x8x8xbf16> to vector<8x8xbf16>
      %74 = vector.shape_cast %71 : vector<8x8xbf16> to vector<1x8x8xbf16>
      tpu.vector_store %arg22[%c1, %c0_50, %c0_51], %74 {strides = array<i32>} : memref<4x8x8xbf16, #tpu.memory_space<vmem>>, vector<1x8x8xbf16>,
      %75 = vector.extract_strided_slice %52 {offsets = [0, 8], sizes = [8, 8], strides = [1, 1]} : vector<8x32xbf16> to vector<8x8xbf16>
      %c1_52 = arith.constant 1 : index
      %c0_53 = arith.constant 0 : index
      %c0_54 = arith.constant 0 : index
      %76 = vector.load %arg23[%c1_52, %c0_53, %c0_54] : memref<4x8x8xbf16, #tpu.memory_space<vmem>>, vector<1x8x8xbf16>
      %77 = vector.shape_cast %76 : vector<1x8x8xbf16> to vector<8x8xbf16>
      %78 = vector.shape_cast %75 : vector<8x8xbf16> to vector<1x8x8xbf16>
      tpu.vector_store %arg23[%c1_52, %c0_53, %c0_54], %78 {strides = array<i32>} : memref<4x8x8xbf16, #tpu.memory_space<vmem>>, vector<1x8x8xbf16>,
      %79 = vector.extract_strided_slice %58 {offsets = [0, 8], sizes = [8, 8], strides = [1, 1]} : vector<8x32xbf16> to vector<8x8xbf16>
      %c1_55 = arith.constant 1 : index
      %c0_56 = arith.constant 0 : index
      %c0_57 = arith.constant 0 : index
      %80 = vector.load %arg24[%c1_55, %c0_56, %c0_57] : memref<4x8x8xbf16, #tpu.memory_space<vmem>>, vector<1x8x8xbf16>
      %81 = vector.shape_cast %80 : vector<1x8x8xbf16> to vector<8x8xbf16>
      %82 = vector.shape_cast %79 : vector<8x8xbf16> to vector<1x8x8xbf16>
      tpu.vector_store %arg24[%c1_55, %c0_56, %c0_57], %82 {strides = array<i32>} : memref<4x8x8xbf16, #tpu.memory_space<vmem>>, vector<1x8x8xbf16>,
      %83 = vector.extract_strided_slice %46 {offsets = [0, 16], sizes = [8, 8], strides = [1, 1]} : vector<8x32xbf16> to vector<8x8xbf16>
      %c2 = arith.constant 2 : index
      %c0_58 = arith.constant 0 : index
      %c0_59 = arith.constant 0 : index
      %84 = vector.load %arg22[%c2, %c0_58, %c0_59] : memref<4x8x8xbf16, #tpu.memory_space<vmem>>, vector<1x8x8xbf16>
      %85 = vector.shape_cast %84 : vector<1x8x8xbf16> to vector<8x8xbf16>
      %86 = vector.shape_cast %83 : vector<8x8xbf16> to vector<1x8x8xbf16>
      tpu.vector_store %arg22[%c2, %c0_58, %c0_59], %86 {strides = array<i32>} : memref<4x8x8xbf16, #tpu.memory_space<vmem>>, vector<1x8x8xbf16>,
      %87 = vector.extract_strided_slice %52 {offsets = [0, 16], sizes = [8, 8], strides = [1, 1]} : vector<8x32xbf16> to vector<8x8xbf16>
      %c2_60 = arith.constant 2 : index
      %c0_61 = arith.constant 0 : index
      %c0_62 = arith.constant 0 : index
      %88 = vector.load %arg23[%c2_60, %c0_61, %c0_62] : memref<4x8x8xbf16, #tpu.memory_space<vmem>>, vector<1x8x8xbf16>
      %89 = vector.shape_cast %88 : vector<1x8x8xbf16> to vector<8x8xbf16>
      %90 = vector.shape_cast %87 : vector<8x8xbf16> to vector<1x8x8xbf16>
      tpu.vector_store %arg23[%c2_60, %c0_61, %c0_62], %90 {strides = array<i32>} : memref<4x8x8xbf16, #tpu.memory_space<vmem>>, vector<1x8x8xbf16>,
      %91 = vector.extract_strided_slice %58 {offsets = [0, 16], sizes = [8, 8], strides = [1, 1]} : vector<8x32xbf16> to vector<8x8xbf16>
      %c2_63 = arith.constant 2 : index
      %c0_64 = arith.constant 0 : index
      %c0_65 = arith.constant 0 : index
      %92 = vector.load %arg24[%c2_63, %c0_64, %c0_65] : memref<4x8x8xbf16, #tpu.memory_space<vmem>>, vector<1x8x8xbf16>
      %93 = vector.shape_cast %92 : vector<1x8x8xbf16> to vector<8x8xbf16>
      %94 = vector.shape_cast %91 : vector<8x8xbf16> to vector<1x8x8xbf16>
      tpu.vector_store %arg24[%c2_63, %c0_64, %c0_65], %94 {strides = array<i32>} : memref<4x8x8xbf16, #tpu.memory_space<vmem>>, vector<1x8x8xbf16>,
      %95 = vector.extract_strided_slice %46 {offsets = [0, 24], sizes = [8, 8], strides = [1, 1]} : vector<8x32xbf16> to vector<8x8xbf16>
      %c3 = arith.constant 3 : index
      %c0_66 = arith.constant 0 : index
      %c0_67 = arith.constant 0 : index
      %96 = vector.load %arg22[%c3, %c0_66, %c0_67] : memref<4x8x8xbf16, #tpu.memory_space<vmem>>, vector<1x8x8xbf16>
      %97 = vector.shape_cast %96 : vector<1x8x8xbf16> to vector<8x8xbf16>
      %98 = vector.shape_cast %95 : vector<8x8xbf16> to vector<1x8x8xbf16>
      tpu.vector_store %arg22[%c3, %c0_66, %c0_67], %98 {strides = array<i32>} : memref<4x8x8xbf16, #tpu.memory_space<vmem>>, vector<1x8x8xbf16>,
      %99 = vector.extract_strided_slice %52 {offsets = [0, 24], sizes = [8, 8], strides = [1, 1]} : vector<8x32xbf16> to vector<8x8xbf16>
      %c3_68 = arith.constant 3 : index
      %c0_69 = arith.constant 0 : index
      %c0_70 = arith.constant 0 : index
      %100 = vector.load %arg23[%c3_68, %c0_69, %c0_70] : memref<4x8x8xbf16, #tpu.memory_space<vmem>>, vector<1x8x8xbf16>
      %101 = vector.shape_cast %100 : vector<1x8x8xbf16> to vector<8x8xbf16>
      %102 = vector.shape_cast %99 : vector<8x8xbf16> to vector<1x8x8xbf16>
      tpu.vector_store %arg23[%c3_68, %c0_69, %c0_70], %102 {strides = array<i32>} : memref<4x8x8xbf16, #tpu.memory_space<vmem>>, vector<1x8x8xbf16>,
      %103 = vector.extract_strided_slice %58 {offsets = [0, 24], sizes = [8, 8], strides = [1, 1]} : vector<8x32xbf16> to vector<8x8xbf16>
      %c3_71 = arith.constant 3 : index
      %c0_72 = arith.constant 0 : index
      %c0_73 = arith.constant 0 : index
      %104 = vector.load %arg24[%c3_71, %c0_72, %c0_73] : memref<4x8x8xbf16, #tpu.memory_space<vmem>>, vector<1x8x8xbf16>
      %105 = vector.shape_cast %104 : vector<1x8x8xbf16> to vector<8x8xbf16>
      %106 = vector.shape_cast %103 : vector<8x8xbf16> to vector<1x8x8xbf16>
      tpu.vector_store %arg24[%c3_71, %c0_72, %c0_73], %106 {strides = array<i32>} : memref<4x8x8xbf16, #tpu.memory_space<vmem>>, vector<1x8x8xbf16>,
      %c0_i32_74 = arith.constant 0 : i32
      %c4_i32 = arith.constant 4 : i32
      %107 = arith.addi %c0_i32_74, %c4_i32 : i32
      %c1_i32 = arith.constant 1 : i32
      scf.for %arg28 = %c0_i32_74 to %107 step %c1_i32  : i32 {
        %150 = arith.index_cast %arg28 : i32 to index
        %c0_107 = arith.constant 0 : index
        %c0_108 = arith.constant 0 : index
        %151 = vector.load %arg22[%150, %c0_107, %c0_108] : memref<4x8x8xbf16, #tpu.memory_space<vmem>>, vector<1x8x8xbf16>
        %152 = vector.shape_cast %151 : vector<1x8x8xbf16> to vector<8x8xbf16>
        %153 = arith.index_cast %arg28 : i32 to index
        %c0_109 = arith.constant 0 : index
        %c0_110 = arith.constant 0 : index
        %154 = vector.load %arg23[%153, %c0_109, %c0_110] : memref<4x8x8xbf16, #tpu.memory_space<vmem>>, vector<1x8x8xbf16>
        %155 = vector.shape_cast %154 : vector<1x8x8xbf16> to vector<8x8xbf16>
        %156 = arith.index_cast %arg28 : i32 to index
        %c0_111 = arith.constant 0 : index
        %c0_112 = arith.constant 0 : index
        %157 = vector.load %arg24[%156, %c0_111, %c0_112] : memref<4x8x8xbf16, #tpu.memory_space<vmem>>, vector<1x8x8xbf16>
        %158 = vector.shape_cast %157 : vector<1x8x8xbf16> to vector<8x8xbf16>
        %cst_113 = arith.constant dense<0.000000e+00> : vector<8x8xf32>
        %159 = tpu.matmul %152, %155, %cst_113 {dimension_numbers = #tpu.dot_dimension_numbers<[1], [1], [0], [0], [0, 0, 1, 0], [], []>} : vector<8x8xbf16>, vector<8x8xbf16>, vector<8x8xf32> -> vector<8x8xf32>
        %160 = arith.addf %159, %38 : vector<8x8xf32>
        %cst_114 = arith.constant dense<0xFF800000> : vector<8xf32>
        %161 = vector.multi_reduction <maximumf>, %160, %cst_114 [1] : vector<8x8xf32> to vector<8xf32>
        %162 = vector.shape_cast %161 : vector<8xf32> to vector<8x1xf32>
        %163 = vector.broadcast %162 : vector<8x1xf32> to vector<8x8xf32>
        %164 = arith.subf %160, %163 : vector<8x8xf32>
        %165 = math.exp %164 : vector<8x8xf32>
        %cst_115 = arith.constant dense<0.000000e+00> : vector<8xf32>
        %166 = vector.multi_reduction <add>, %165, %cst_115 [1] : vector<8x8xf32> to vector<8xf32>
        %167 = vector.shape_cast %166 : vector<8xf32> to vector<8x1xf32>
        %168 = tpu.reciprocal %167 {approx = true} : vector<8x1xf32> -> vector<8x1xf32>
        %169 = vector.broadcast %168 : vector<8x1xf32> to vector<8x8xf32>
        %170 = arith.mulf %165, %169 : vector<8x8xf32>
        %171 = arith.truncf %170 : vector<8x8xf32> to vector<8x8xbf16>
        %cst_116 = arith.constant dense<0.000000e+00> : vector<8x8xf32>
        %172 = tpu.matmul %171, %158, %cst_116 {dimension_numbers = #tpu.dot_dimension_numbers<[1], [0], [0], [1], [0, 0, 1, 1], [], []>} : vector<8x8xbf16>, vector<8x8xbf16>, vector<8x8xf32> -> vector<8x8xf32>
        %173 = arith.truncf %172 : vector<8x8xf32> to vector<8x8xbf16>
        %174 = arith.index_cast %arg28 : i32 to index
        %c0_117 = arith.constant 0 : index
        %c0_118 = arith.constant 0 : index
        %175 = vector.load %arg25[%174, %c0_117, %c0_118] : memref<4x8x8xbf16, #tpu.memory_space<vmem>>, vector<1x8x8xbf16>
        %176 = vector.shape_cast %175 : vector<1x8x8xbf16> to vector<8x8xbf16>
        %177 = vector.shape_cast %173 : vector<8x8xbf16> to vector<1x8x8xbf16>
        tpu.vector_store %arg25[%174, %c0_117, %c0_118], %177 {strides = array<i32>} : memref<4x8x8xbf16, #tpu.memory_space<vmem>>, vector<1x8x8xbf16>,
      }
      %c4_i32_75 = arith.constant 4 : i32
      %c0_76 = arith.constant 0 : index
      %c0_77 = arith.constant 0 : index
      %c0_78 = arith.constant 0 : index
      %108 = vector.load %arg25[%c0_76, %c0_77, %c0_78] : memref<4x8x8xbf16, #tpu.memory_space<vmem>>, vector<1x8x8xbf16>
      %109 = vector.shape_cast %108 : vector<1x8x8xbf16> to vector<8x8xbf16>
      %c1_79 = arith.constant 1 : index
      %c0_80 = arith.constant 0 : index
      %c0_81 = arith.constant 0 : index
      %110 = vector.load %arg25[%c1_79, %c0_80, %c0_81] : memref<4x8x8xbf16, #tpu.memory_space<vmem>>, vector<1x8x8xbf16>
      %111 = vector.shape_cast %110 : vector<1x8x8xbf16> to vector<8x8xbf16>
      %c2_82 = arith.constant 2 : index
      %c0_83 = arith.constant 0 : index
      %c0_84 = arith.constant 0 : index
      %112 = vector.load %arg25[%c2_82, %c0_83, %c0_84] : memref<4x8x8xbf16, #tpu.memory_space<vmem>>, vector<1x8x8xbf16>
      %113 = vector.shape_cast %112 : vector<1x8x8xbf16> to vector<8x8xbf16>
      %c3_85 = arith.constant 3 : index
      %c0_86 = arith.constant 0 : index
      %c0_87 = arith.constant 0 : index
      %114 = vector.load %arg25[%c3_85, %c0_86, %c0_87] : memref<4x8x8xbf16, #tpu.memory_space<vmem>>, vector<1x8x8xbf16>
      %115 = vector.shape_cast %114 : vector<1x8x8xbf16> to vector<8x8xbf16>
      %116 = tpu.concatenate %109, %111, %113, %115 in 1 : vector<8x8xbf16>, vector<8x8xbf16>, vector<8x8xbf16>, vector<8x8xbf16> -> vector<8x32xbf16>
      %c0_88 = arith.constant 0 : index
      %c0_89 = arith.constant 0 : index
      %117 = vector.load %arg10[%c0_88, %c0_89] : memref<32x32xbf16, #tpu.memory_space<vmem>>, vector<32x32xbf16>
      %cst_90 = arith.constant dense<0.000000e+00> : vector<8x32xf32>
      %118 = tpu.matmul %116, %117, %cst_90 {dimension_numbers = #tpu.dot_dimension_numbers<[1], [0], [0], [1], [0, 0, 1, 1], [], []>} : vector<8x32xbf16>, vector<32x32xbf16>, vector<8x32xf32> -> vector<8x32xf32>
      %c0_91 = arith.constant 0 : index
      %c0_92 = arith.constant 0 : index
      %119 = vector.load %arg11[%c0_91, %c0_92] : memref<1x32xf32, #tpu.memory_space<vmem>>, vector<1x32xf32>
      %120 = vector.broadcast %119 : vector<1x32xf32> to vector<8x32xf32>
      %121 = arith.addf %118, %120 : vector<8x32xf32>
      %122 = arith.addf %121, %33 : vector<8x32xf32>
      %c0_93 = arith.constant 0 : index
      %c0_94 = arith.constant 0 : index
      %123 = vector.load %arg12[%c0_93, %c0_94] : memref<1x32xf32, #tpu.memory_space<vmem>>, vector<1x32xf32>
      %c0_95 = arith.constant 0 : index
      %c0_96 = arith.constant 0 : index
      %124 = vector.load %arg13[%c0_95, %c0_96] : memref<1x32xf32, #tpu.memory_space<vmem>>, vector<1x32xf32>
      %cst_97 = arith.constant dense<0.000000e+00> : vector<8xf32>
      %125 = vector.multi_reduction <add>, %122, %cst_97 [1] : vector<8x32xf32> to vector<8xf32>
      %126 = vector.shape_cast %125 : vector<8xf32> to vector<8x1xf32>
      %cst_98 = arith.constant 3.200000e+01 : f32
      %127 = vector.broadcast %cst_98 : f32 to vector<8x1xf32>
      %128 = arith.divf %126, %127 : vector<8x1xf32>
      %129 = vector.broadcast %128 : vector<8x1xf32> to vector<8x32xf32>
      %130 = arith.subf %122, %129 : vector<8x32xf32>
      %131 = arith.mulf %130, %130 : vector<8x32xf32>
      %cst_99 = arith.constant dense<0.000000e+00> : vector<8xf32>
      %132 = vector.multi_reduction <add>, %131, %cst_99 [1] : vector<8x32xf32> to vector<8xf32>
      %133 = vector.shape_cast %132 : vector<8xf32> to vector<8x1xf32>
      %cst_100 = arith.constant 3.200000e+01 : f32
      %134 = vector.broadcast %cst_100 : f32 to vector<8x1xf32>
      %135 = arith.divf %133, %134 : vector<8x1xf32>
      %136 = vector.broadcast %128 : vector<8x1xf32> to vector<8x32xf32>
      %137 = arith.subf %122, %136 : vector<8x32xf32>
      %cst_101 = arith.constant 9.99999996E-13 : f32
      %138 = vector.broadcast %cst_101 : f32 to vector<8x1xf32>
      %139 = arith.addf %135, %138 : vector<8x1xf32>
      %140 = math.rsqrt %139 : vector<8x1xf32>
      %141 = vector.broadcast %140 : vector<8x1xf32> to vector<8x32xf32>
      %142 = arith.mulf %137, %141 : vector<8x32xf32>
      %143 = vector.broadcast %123 : vector<1x32xf32> to vector<8x32xf32>
      %144 = arith.mulf %142, %143 : vector<8x32xf32>
      %145 = vector.broadcast %124 : vector<1x32xf32> to vector<8x32xf32>
      %146 = arith.addf %144, %145 : vector<8x32xf32>
      %c0_102 = arith.constant 0 : index
      %c0_103 = arith.constant 0 : index
      %147 = vector.load %arg26[%c0_102, %c0_103] : memref<8x32xf32, #tpu.memory_space<vmem>>, vector<8x32xf32>
      tpu.vector_store %arg26[%c0_102, %c0_103], %146 {strides = array<i32>} : memref<8x32xf32, #tpu.memory_space<vmem>>, vector<8x32xf32>,
      %cst_104 = arith.constant 0.000000e+00 : f32
      %148 = vector.broadcast %cst_104 : f32 to vector<8x32xf32>
      %c0_105 = arith.constant 0 : index
      %c0_106 = arith.constant 0 : index
      %149 = vector.load %arg27[%c0_105, %c0_106] : memref<8x32xf32, #tpu.memory_space<vmem>>, vector<8x32xf32>
      tpu.vector_store %arg27[%c0_105, %c0_106], %148 {strides = array<i32>} : memref<8x32xf32, #tpu.memory_space<vmem>>, vector<8x32xf32>,
    } else {
    }
    %c0 = arith.constant 0 : index
    %c0_1 = arith.constant 0 : index
    %3 = vector.load %arg26[%c0, %c0_1] : memref<8x32xf32, #tpu.memory_space<vmem>>, vector<8x32xf32>
    %4 = arith.truncf %3 : vector<8x32xf32> to vector<8x32xbf16>
    %c0_2 = arith.constant 0 : index
    %c0_3 = arith.constant 0 : index
    %5 = vector.load %arg14[%c0_2, %c0_3] : memref<32x64xbf16, #tpu.memory_space<vmem>>, vector<32x64xbf16>
    %cst = arith.constant dense<0.000000e+00> : vector<8x64xf32>
    %6 = tpu.matmul %4, %5, %cst {dimension_numbers = #tpu.dot_dimension_numbers<[1], [0], [0], [1], [0, 0, 1, 1], [], []>} : vector<8x32xbf16>, vector<32x64xbf16>, vector<8x64xf32> -> vector<8x64xf32>
    %c0_4 = arith.constant 0 : index
    %c0_5 = arith.constant 0 : index
    %7 = vector.load %arg15[%c0_4, %c0_5] : memref<1x64xf32, #tpu.memory_space<vmem>>, vector<1x64xf32>
    %8 = vector.broadcast %7 : vector<1x64xf32> to vector<8x64xf32>
    %9 = arith.addf %6, %8 : vector<8x64xf32>
    %10 = arith.mulf %9, %9 : vector<8x64xf32>
    %11 = arith.mulf %9, %10 : vector<8x64xf32>
    %cst_6 = arith.constant 4.471500e-02 : f32
    %12 = vector.broadcast %cst_6 : f32 to vector<8x64xf32>
    %13 = arith.mulf %12, %11 : vector<8x64xf32>
    %14 = arith.addf %9, %13 : vector<8x64xf32>
    %cst_7 = arith.constant 0.797884583 : f32
    %15 = vector.broadcast %cst_7 : f32 to vector<8x64xf32>
    %16 = arith.mulf %15, %14 : vector<8x64xf32>
    %17 = math.tanh %16 : vector<8x64xf32>
    %cst_8 = arith.constant 1.000000e+00 : f32
    %18 = vector.broadcast %cst_8 : f32 to vector<8x64xf32>
    %19 = arith.addf %18, %17 : vector<8x64xf32>
    %cst_9 = arith.constant 5.000000e-01 : f32
    %20 = vector.broadcast %cst_9 : f32 to vector<8x64xf32>
    %21 = arith.mulf %20, %19 : vector<8x64xf32>
    %22 = arith.mulf %9, %21 : vector<8x64xf32>
    %c0_10 = arith.constant 0 : index
    %c0_11 = arith.constant 0 : index
    %23 = vector.load %arg27[%c0_10, %c0_11] : memref<8x32xf32, #tpu.memory_space<vmem>>, vector<8x32xf32>
    %24 = arith.truncf %22 : vector<8x64xf32> to vector<8x64xbf16>
    %c0_12 = arith.constant 0 : index
    %c0_13 = arith.constant 0 : index
    %25 = vector.load %arg16[%c0_12, %c0_13] : memref<64x32xbf16, #tpu.memory_space<vmem>>, vector<64x32xbf16>
    %cst_14 = arith.constant dense<0.000000e+00> : vector<8x32xf32>
    %26 = tpu.matmul %24, %25, %cst_14 {dimension_numbers = #tpu.dot_dimension_numbers<[1], [0], [0], [1], [0, 0, 1, 1], [], []>} : vector<8x64xbf16>, vector<64x32xbf16>, vector<8x32xf32> -> vector<8x32xf32>
    %27 = arith.addf %23, %26 : vector<8x32xf32>
    %c0_15 = arith.constant 0 : index
    %c0_16 = arith.constant 0 : index
    %28 = vector.load %arg27[%c0_15, %c0_16] : memref<8x32xf32, #tpu.memory_space<vmem>>, vector<8x32xf32>
    tpu.vector_store %arg27[%c0_15, %c0_16], %27 {strides = array<i32>} : memref<8x32xf32, #tpu.memory_space<vmem>>, vector<8x32xf32>,
    %c0_i32_17 = arith.constant 0 : i32
    %29 = arith.cmpi eq, %arg1, %c0_i32_17 : i32
    %30 = arith.extui %29 : i1 to i32
    %c0_i32_18 = arith.constant 0 : i32
    %31 = arith.cmpi ne, %30, %c0_i32_18 : i32
    scf.if %31 {
      %c0_19 = arith.constant 0 : index
      %c0_20 = arith.constant 0 : index
      %32 = vector.load %arg27[%c0_19, %c0_20] : memref<8x32xf32, #tpu.memory_space<vmem>>, vector<8x32xf32>
      %c0_21 = arith.constant 0 : index
      %c0_22 = arith.constant 0 : index
      %33 = vector.load %arg17[%c0_21, %c0_22] : memref<1x32xf32, #tpu.memory_space<vmem>>, vector<1x32xf32>
      %34 = vector.broadcast %33 : vector<1x32xf32> to vector<8x32xf32>
      %35 = arith.addf %32, %34 : vector<8x32xf32>
      %c0_23 = arith.constant 0 : index
      %c0_24 = arith.constant 0 : index
      %c0_25 = arith.constant 0 : index
      %36 = vector.load %arg20[%c0_23, %c0_24, %c0_25] : memref<1x8x32xf32, #tpu.memory_space<vmem>>, vector<1x8x32xf32>
      %37 = vector.shape_cast %36 : vector<1x8x32xf32> to vector<8x32xf32>
      %38 = arith.mulf %35, %37 : vector<8x32xf32>
      %c0_26 = arith.constant 0 : index
      %c0_27 = arith.constant 0 : index
      %39 = vector.load %arg26[%c0_26, %c0_27] : memref<8x32xf32, #tpu.memory_space<vmem>>, vector<8x32xf32>
      %40 = arith.addf %38, %39 : vector<8x32xf32>
      %c0_28 = arith.constant 0 : index
      %c0_29 = arith.constant 0 : index
      %41 = vector.load %arg18[%c0_28, %c0_29] : memref<1x32xf32, #tpu.memory_space<vmem>>, vector<1x32xf32>
      %c0_30 = arith.constant 0 : index
      %c0_31 = arith.constant 0 : index
      %42 = vector.load %arg19[%c0_30, %c0_31] : memref<1x32xf32, #tpu.memory_space<vmem>>, vector<1x32xf32>
      %cst_32 = arith.constant dense<0.000000e+00> : vector<8xf32>
      %43 = vector.multi_reduction <add>, %40, %cst_32 [1] : vector<8x32xf32> to vector<8xf32>
      %44 = vector.shape_cast %43 : vector<8xf32> to vector<8x1xf32>
      %cst_33 = arith.constant 3.200000e+01 : f32
      %45 = vector.broadcast %cst_33 : f32 to vector<8x1xf32>
      %46 = arith.divf %44, %45 : vector<8x1xf32>
      %47 = vector.broadcast %46 : vector<8x1xf32> to vector<8x32xf32>
      %48 = arith.subf %40, %47 : vector<8x32xf32>
      %49 = arith.mulf %48, %48 : vector<8x32xf32>
      %cst_34 = arith.constant dense<0.000000e+00> : vector<8xf32>
      %50 = vector.multi_reduction <add>, %49, %cst_34 [1] : vector<8x32xf32> to vector<8xf32>
      %51 = vector.shape_cast %50 : vector<8xf32> to vector<8x1xf32>
      %cst_35 = arith.constant 3.200000e+01 : f32
      %52 = vector.broadcast %cst_35 : f32 to vector<8x1xf32>
      %53 = arith.divf %51, %52 : vector<8x1xf32>
      %54 = vector.broadcast %46 : vector<8x1xf32> to vector<8x32xf32>
      %55 = arith.subf %40, %54 : vector<8x32xf32>
      %cst_36 = arith.constant 9.99999996E-13 : f32
      %56 = vector.broadcast %cst_36 : f32 to vector<8x1xf32>
      %57 = arith.addf %53, %56 : vector<8x1xf32>
      %58 = math.rsqrt %57 : vector<8x1xf32>
      %59 = vector.broadcast %58 : vector<8x1xf32> to vector<8x32xf32>
      %60 = arith.mulf %55, %59 : vector<8x32xf32>
      %61 = vector.broadcast %41 : vector<1x32xf32> to vector<8x32xf32>
      %62 = arith.mulf %60, %61 : vector<8x32xf32>
      %63 = vector.broadcast %42 : vector<1x32xf32> to vector<8x32xf32>
      %64 = arith.addf %62, %63 : vector<8x32xf32>
      %c0_37 = arith.constant 0 : index
      %c0_38 = arith.constant 0 : index
      %c0_39 = arith.constant 0 : index
      %65 = vector.load %arg21[%c0_37, %c0_38, %c0_39] : memref<1x8x32xf32, #tpu.memory_space<vmem>>, vector<1x8x32xf32>
      %66 = vector.shape_cast %65 : vector<1x8x32xf32> to vector<8x32xf32>
      %67 = vector.shape_cast %64 : vector<8x32xf32> to vector<1x8x32xf32>
      tpu.vector_store %arg21[%c0_37, %c0_38, %c0_39], %67 {strides = array<i32>} : memref<1x8x32xf32, #tpu.memory_space<vmem>>, vector<1x8x32xf32>,
    } else {
    }
    return
  }
  func.func @transform_0(%arg0: i32, %arg1: i32) -> (i32, i32, i32) {
    %c0_i32 = arith.constant 0 : i32
    %c0_i32_0 = arith.constant 0 : i32
    %c0_i32_1 = arith.constant 0 : i32
    return %arg0, %c0_i32, %c0_i32_0 : i32, i32, i32
  }
  func.func @transform_1(%arg0: i32, %arg1: i32) -> (i32, i32, i32) {
    %c0_i32 = arith.constant 0 : i32
    %c0_i32_0 = arith.constant 0 : i32
    %c0_i32_1 = arith.constant 0 : i32
    return %arg0, %c0_i32, %c0_i32_0 : i32, i32, i32
  }
  func.func @transform_2(%arg0: i32, %arg1: i32) -> (i32, i32) {
    %c0_i32 = arith.constant 0 : i32
    %c0_i32_0 = arith.constant 0 : i32
    %c0_i32_1 = arith.constant 0 : i32
    return %c0_i32, %c0_i32_0 : i32, i32
  }
  func.func @transform_3(%arg0: i32, %arg1: i32) -> (i32, i32) {
    %c0_i32 = arith.constant 0 : i32
    %c0_i32_0 = arith.constant 0 : i32
    %c0_i32_1 = arith.constant 0 : i32
    return %c0_i32, %c0_i32_0 : i32, i32
  }
  func.func @transform_4(%arg0: i32, %arg1: i32) -> (i32, i32) {
    %c0_i32 = arith.constant 0 : i32
    %c0_i32_0 = arith.constant 0 : i32
    %c0_i32_1 = arith.constant 0 : i32
    return %c0_i32, %c0_i32_0 : i32, i32
  }
  func.func @transform_5(%arg0: i32, %arg1: i32) -> (i32, i32) {
    %c0_i32 = arith.constant 0 : i32
    %c0_i32_0 = arith.constant 0 : i32
    %c0_i32_1 = arith.constant 0 : i32
    return %c0_i32, %c0_i32_0 : i32, i32
  }
  func.func @transform_6(%arg0: i32, %arg1: i32) -> (i32, i32) {
    %c0_i32 = arith.constant 0 : i32
    %c0_i32_0 = arith.constant 0 : i32
    %c0_i32_1 = arith.constant 0 : i32
    return %c0_i32, %c0_i32_0 : i32, i32
  }
  func.func @transform_7(%arg0: i32, %arg1: i32) -> (i32, i32) {
    %c0_i32 = arith.constant 0 : i32
    %c0_i32_0 = arith.constant 0 : i32
    %c0_i32_1 = arith.constant 0 : i32
    return %c0_i32, %c0_i32_0 : i32, i32
  }
  func.func @transform_8(%arg0: i32, %arg1: i32) -> (i32, i32) {
    %c0_i32 = arith.constant 0 : i32
    %c0_i32_0 = arith.constant 0 : i32
    %c0_i32_1 = arith.constant 0 : i32
    return %c0_i32, %c0_i32_0 : i32, i32
  }
  func.func @transform_9(%arg0: i32, %arg1: i32) -> (i32, i32) {
    %c0_i32 = arith.constant 0 : i32
    %c0_i32_0 = arith.constant 0 : i32
    %c0_i32_1 = arith.constant 0 : i32
    return %c0_i32, %c0_i32_0 : i32, i32
  }
  func.func @transform_10(%arg0: i32, %arg1: i32) -> (i32, i32) {
    %c0_i32 = arith.constant 0 : i32
    %c0_i32_0 = arith.constant 0 : i32
    %c0_i32_1 = arith.constant 0 : i32
    return %c0_i32, %c0_i32_0 : i32, i32
  }
  func.func @transform_11(%arg0: i32, %arg1: i32) -> (i32, i32) {
    %c0_i32 = arith.constant 0 : i32
    %c0_i32_0 = arith.constant 0 : i32
    %c0_i32_1 = arith.constant 0 : i32
    return %c0_i32, %c0_i32_0 : i32, i32
  }
  func.func @transform_12(%arg0: i32, %arg1: i32) -> (i32, i32) {
    %c0_i32 = arith.constant 0 : i32
    %c0_i32_0 = arith.constant 0 : i32
    return %c0_i32, %arg1 : i32, i32
  }
  func.func @transform_13(%arg0: i32, %arg1: i32) -> (i32, i32) {
    %c0_i32 = arith.constant 0 : i32
    %c0_i32_0 = arith.constant 0 : i32
    return %c0_i32, %arg1 : i32, i32
  }
  func.func @transform_14(%arg0: i32, %arg1: i32) -> (i32, i32) {
    %c0_i32 = arith.constant 0 : i32
    %c0_i32_0 = arith.constant 0 : i32
    return %arg1, %c0_i32 : i32, i32
  }
  func.func @transform_15(%arg0: i32, %arg1: i32) -> (i32, i32) {
    %c0_i32 = arith.constant 0 : i32
    %c0_i32_0 = arith.constant 0 : i32
    %c0_i32_1 = arith.constant 0 : i32
    return %c0_i32, %c0_i32_0 : i32, i32
  }
  func.func @transform_16(%arg0: i32, %arg1: i32) -> (i32, i32) {
    %c0_i32 = arith.constant 0 : i32
    %c0_i32_0 = arith.constant 0 : i32
    %c0_i32_1 = arith.constant 0 : i32
    return %c0_i32, %c0_i32_0 : i32, i32
  }
  func.func @transform_17(%arg0: i32, %arg1: i32) -> (i32, i32) {
    %c0_i32 = arith.constant 0 : i32
    %c0_i32_0 = arith.constant 0 : i32
    %c0_i32_1 = arith.constant 0 : i32
    return %c0_i32, %c0_i32_0 : i32, i32
  }
  func.func @transform_18(%arg0: i32, %arg1: i32) -> (i32, i32, i32) {
    %c0_i32 = arith.constant 0 : i32
    %c0_i32_0 = arith.constant 0 : i32
    %c0_i32_1 = arith.constant 0 : i32
    return %arg0, %c0_i32, %c0_i32_0 : i32, i32, i32
  }
  func.func @transform_19(%arg0: i32, %arg1: i32) -> (i32, i32, i32) {
    %c0_i32 = arith.constant 0 : i32
    %c0_i32_0 = arith.constant 0 : i32
    %c0_i32_1 = arith.constant 0 : i32
    return %arg0, %c0_i32, %c0_i32_0 : i32, i32, i32
  }
}

</mosaic_0001>

<bundles_post_ra>
// kernel: tpu_custom_call.1
= control target key start
LH: loop header
LB: loop body
LE: loop exit
PB: predicated region body
PF: predicated region fallthrough
CT: control target
= control target key end

     0   :  { %s3129_s0 = inlined_call_operand.vmem [shape: f32[2,8,32], index: 0, kind: input, shape index: {}]   ;;  %s3130_s1 = inlined_call_operand.hbm [shape: f32[2,1,8], index: 1, kind: input, shape index: {}]   ;;  %s3131_s2 = inlined_call_operand.vmem [shape: bf16[32,32], index: 2, kind: input, shape index: {}]   ;;  %s3132_s3 = inlined_call_operand.vmem [shape: f32[1,32], index: 3, kind: input, shape index: {}]   ;;  %s3133_s4 = inlined_call_operand.vmem [shape: bf16[32,32], index: 4, kind: input, shape index: {}]   ;;  %s3134_s5 = inlined_call_operand.hbm [shape: f32[1,32], index: 5, kind: input, shape index: {}]   ;;  %s3135_s6 = inlined_call_operand.hbm [shape: bf16[32,32], index: 6, kind: input, shape index: {}]   ;;  %s3136_s7 = inlined_call_operand.hbm [shape: f32[1,32], index: 7, kind: input, shape index: {}]   ;;  %s3137_s8 = inlined_call_operand.hbm [shape: bf16[32,32], index: 8, kind: input, shape index: {}]   ;;  %s3138_s9 = inlined_call_operand.hbm [shape: f32[1,32], index: 9, kind: input, shape index: {}]   ;;  %s3139_s10 = inlined_call_operand.hbm [shape: f32[1,32], index: 10, kind: input, shape index: {}]   ;;  %s3140_s11 = inlined_call_operand.hbm [shape: f32[1,32], index: 11, kind: input, shape index: {}]   ;;  %s3141_s12 = inlined_call_operand.vmem [shape: bf16[32,64], index: 12, kind: input, shape index: {}]   ;;  %s3142_s13 = inlined_call_operand.hbm [shape: f32[1,64], index: 13, kind: input, shape index: {}]   ;;  %s3143_s14 = inlined_call_operand.vmem [shape: bf16[64,32], index: 14, kind: input, shape index: {}]   ;;  %s3144_s15 = inlined_call_operand.vmem [shape: f32[1,32], index: 15, kind: input, shape index: {}]   ;;  %s3145_s16 = inlined_call_operand.vmem [shape: f32[1,32], index: 16, kind: input, shape index: {}]   ;;  %s3146_s17 = inlined_call_operand.vmem [shape: f32[1,32], index: 17, kind: input, shape index: {}]   ;;  %s3147_s18 = inlined_call_operand.vmem [shape: f32[2,8,32], index: 18, kind: input, shape index: {}]   ;;  %s3148_s19 = inlined_call_operand.hbm [shape: f32[2,8,32], index: 19, kind: output, shape index: {}]  }
   0x1   :  { %3161 = sst [smem:[#allocation30_spill]] %s3129_s0 }
   0x2   :  { %3162 = sst [smem:[#allocation31_spill]] %s3130_s1 }
   0x3   :  { %3163 = sst [smem:[#allocation32_spill]] %s3131_s2 }
   0x4   :  { %3164 = sst [smem:[#allocation33_spill]] %s3132_s3 }
   0x5   :  { %3165 = sst [smem:[#allocation34_spill]] %s3133_s4 }
   0x6   :  { %3166 = sst [smem:[#allocation35_spill]] %s3134_s5 }
   0x7   :  { %3167 = sst [smem:[#allocation36_spill]] %s3135_s6 }
   0x8   :  { %3168 = sst [smem:[#allocation37_spill]] %s3136_s7 }
   0x9   :  { %3169 = sst [smem:[#allocation38_spill]] %s3137_s8 }
   0xa   :  { %3170 = sst [smem:[#allocation39_spill]] %s3138_s9 }
   0xb   :  { %3171 = sst [smem:[#allocation40_spill]] %s3140_s11 }
   0xc   :  { %3172 = sst [smem:[#allocation41_spill]] %s3141_s12 }
   0xd   :  { %3173 = sst [smem:[#allocation42_spill]] %s3143_s14 }
   0xe   :  { %3174 = sst [smem:[#allocation43_spill]] %s3144_s15 }
   0xf   :  { %3175 = sst [smem:[#allocation44_spill]] %s3145_s16 }
  0x10   :  { %3176 = sst [smem:[#allocation45_spill]] %s3146_s17 }
  0x11   :  { %3177 = sst [smem:[#allocation46_spill]] %s3148_s19 }
  0x12   :  { %24 = vsyncpa [#allocation9], 0 }
  0x13   :  { %26 = vsyncpa [#allocation9 + $0x1], 0 }
  0x14   :  { %27 = vsyncpa [#allocation12], 0 }
  0x15   :  { %28 = vsyncpa [#allocation15], 0 }
  0x16   :  { %29 = vsyncpa [#allocation18], 0 }
  0x17   :  { %30 = vsyncpa [#allocation21], 0 }
  0x18   :  { %31 = vsyncpa [#allocation10], 0 }
  0x19   :  { %33 = vsyncpa [#allocation10 + $0x1], 0  ;;  %s2613_s0 = smov 0   ;;  %s2615_s30 = smov 0  }
  0x1a   :  { %s2617_s20 = smov 0   ;;  %s2619_s21 = smov 0  }
  0x1b   :  { %s2621_s1 = smov 0   ;;  %s2623_s22 = smov 0  }
  0x1c LB: > { %s3151_s2 = sadd.s32 4294967295, %s2485_s22   ;;  %p1776_p0 = scmp.ge.s32.totalorder %s2485_s22, 1  ;;  %s2485_s22 = sphi %s2623_s22, %s39_s22   ;;  %s2481_s1 = sphi %s2621_s1, %s3216_s1   ;;  %s2477_s21 = sphi %s2619_s21, %s3215_s21   ;;  %s2473_s20 = sphi %s2617_s20, %s3214_s20   ;;  %s2469_s30 = sphi %s2615_s30, %s3213_s30   ;;  %s2465_s0 = sphi %s2613_s0, %s3212_s0  }
  0x1d   : > { %p2647_p1 = scmp.eq.s32.totalorder %s3151_s2, 0  ;;  %p511_p2 = scmp.lt.s32.totalorder %s2485_s22, 3 }
  0x1e   : > { %s2491_s25 = smov [#allocation11]   ;;  %s2492_s26 = smov [#allocation14]  }
  0x1f   : > { %s3178_s23 = scalar_select %p2647_p1, 1, 0 }
  0x20   : > { %p2652_p3 = pnand %p1776_p0, %p511_p2  ;;  %s533_s3 = sshll.u32 %s2491_s25, 4  ;;  %s534_s3 = int_to_ptr.vmem [resolvable:$true] %s533_s3 }
  0x21   : > { %s557_s27 = sshll.u32 %s2492_s26, 4  ;;  %s2493_s29 = smov [#allocation17]   ;;  %s2665_s27 = int_to_ptr.vmem [resolvable:$true] %s557_s27 }
  0x22   : > { %s3179_s24 = scalar_select %p2652_p3, 1, 0 }
  0x23   : > { %p1975_p5 = pneg %p2652_p3  ;;  %s581_s2 = sshll.u32 %s2493_s29, 4  ;;  %s2667_s2 = int_to_ptr.vmem [resolvable:$true] %s581_s2 }
  0x24   : > { %s3181_s5 = sld [smem:[#allocation35_spill]] }
  0x25   : > { %p2661_p6 = pnand %p1975_p5, %p2647_p1 }
  0x27   : > { %p2677_p8 = pneg %p2661_p6 }
  0x2a   : > { %s2129_s17 = scalar_lea.hbm %s3181_s5, 16 }
  0x2b   : > { %p2130_p7 = scmp.ne.s32.totalorder %s3181_s5, %s2129_s17  ;;  %p2136_p11 = scmp.lt.u32.totalorder %s2129_s17, %s3181_s5 }
  0x2d   : > { %p2132_p9 = pnand %p2677_p8, %p2130_p7 }
  0x2f   : > { %p2133_p10 = pneg %p2132_p9 }
  0x31   : > { %p2138_p12 = pnand %p2136_p11, %p2133_p10 }
  0x33   : > { %2141 = shalt.err (!%p2138_p12)
}
  0x34   : > { %s2142_s19 = scalar_lea.vmem %s534_s3, 16  ;;  %s2149_s15 = scalar_lea.vmem %s534_s3, 32 }
  0x35   : > { %p2143_p13 = scmp.ne.s32.totalorder %s534_s3, %s2142_s19  ;;  %p2150_p5 = scmp.lt.s32.totalorder %s534_s3, %s534_s3 }
  0x36   : > { %p2151_p4 = scmp.lt.s32.totalorder %s2149_s15, %s2142_s19 }
  0x37   : > { %p2145_p0 = pnand %p2143_p13, %p2677_p8 }
  0x38   : > { %p2152_p3 = por %p2151_p4, %p2150_p5 }
  0x39   : > { %p2146_p2 = pneg %p2145_p0 }
  0x3b   : > { %p2153_p1 = pnand %p2152_p3, %p2146_p2 }
  0x3d   : > { %2156 = shalt.err (!%p2153_p1)
}
  0x3e   : > { %1978 = dma.hbm_to_vmem [thread:$0]  (!%p2661_p6), %s3181_s5, 16, %s534_s3, [#allocation12]  }
  0x3f   : > { %s3183_s7 = sld [smem:[#allocation37_spill]] }
  0x45   : > { %s2157_s29 = scalar_lea.hbm %s3183_s7, 16 }
  0x46   : > { %p2158_p7 = scmp.ne.s32.totalorder %s3183_s7, %s2157_s29  ;;  %p2164_p1 = scmp.lt.u32.totalorder %s2157_s29, %s3183_s7 }
  0x48   : > { %p2160_p9 = pnand %p2158_p7, %p2677_p8 }
  0x4a   : > { %p2161_p4 = pneg %p2160_p9 }
  0x4c   : > { %p2166_p3 = pnand %p2164_p1, %p2161_p4 }
  0x4e   : > { %2169 = shalt.err (!%p2166_p3)
}
  0x4f   : > { %s2170_s3 = scalar_lea.vmem %s2665_s27, 16  ;;  %s2177_s4 = scalar_lea.vmem %s2665_s27, 32 }
  0x50   : > { %p2171_p10 = scmp.ne.s32.totalorder %s2665_s27, %s2170_s3  ;;  %p2178_p13 = scmp.lt.s32.totalorder %s2665_s27, %s2665_s27 }
  0x51   : > { %p2179_p0 = scmp.lt.s32.totalorder %s2177_s4, %s2170_s3 }
  0x52   : > { %p2173_p11 = pnand %p2171_p10, %p2677_p8 }
  0x53   : > { %p2180_p2 = por %p2179_p0, %p2178_p13 }
  0x54   : > { %p2174_p12 = pneg %p2173_p11 }
  0x56   : > { %p2181_p5 = pnand %p2180_p2, %p2174_p12 }
  0x58   : > { %2184 = shalt.err (!%p2181_p5)
}
  0x59   : > { %1984 = dma.hbm_to_vmem [thread:$0]  (!%p2661_p6), %s3183_s7, 16, %s2665_s27, [#allocation15]  }
  0x5a   : > { %s3184_s9 = sld [smem:[#allocation39_spill]] }
  0x60   : > { %s2185_s17 = scalar_lea.hbm %s3184_s9, 16 }
  0x61   : > { %p2186_p7 = scmp.ne.s32.totalorder %s3184_s9, %s2185_s17  ;;  %p2192_p1 = scmp.lt.u32.totalorder %s2185_s17, %s3184_s9 }
  0x63   : > { %p2188_p9 = pnand %p2186_p7, %p2677_p8 }
  0x65   : > { %p2189_p4 = pneg %p2188_p9 }
  0x67   : > { %p2194_p3 = pnand %p2192_p1, %p2189_p4 }
  0x69   : > { %2197 = shalt.err (!%p2194_p3)
}
  0x6a   : > { %s2198_s27 = scalar_lea.vmem %s2667_s2, 16  ;;  %s2205_s4 = scalar_lea.vmem %s2667_s2, 32 }
  0x6b   : > { %p2199_p10 = scmp.ne.s32.totalorder %s2667_s2, %s2198_s27  ;;  %p2206_p13 = scmp.lt.s32.totalorder %s2667_s2, %s2667_s2 }
  0x6c   : > { %p2207_p0 = scmp.lt.s32.totalorder %s2205_s4, %s2198_s27 }
  0x6d   : > { %p2201_p11 = pnand %p2199_p10, %p2677_p8 }
  0x6e   : > { %p2208_p2 = por %p2207_p0, %p2206_p13 }
  0x6f   : > { %p2202_p12 = pneg %p2201_p11 }
  0x71   : > { %p2209_p5 = pnand %p2208_p2, %p2202_p12 }
  0x73   : > { %2212 = shalt.err (!%p2209_p5)
}
  0x74   : > { %1990 = dma.hbm_to_vmem [thread:$0]  (!%p2661_p6), %s3184_s9, 16, %s2667_s2, [#allocation18]  }
  0x75   : > { %s2494_s25 = smov [#allocation20]   ;;  %s2495_s17 = smov [#allocation13]  }
  0x76   : > { %s603_s14 = sshll.u32 %s2494_s25, 4  ;;  %s543_s29 = sshll.u32 %s2495_s17, 4  ;;  %s604_s14 = int_to_ptr.vmem [resolvable:$true] %s603_s14  ;;  %s544_s29 = int_to_ptr.vmem [resolvable:$true] %s543_s29 }
  0x77   : > { %s3185_s11 = sld [smem:[#allocation40_spill]] }
  0x7d   : > { %s2213_s3 = scalar_lea.hbm %s3185_s11, 16 }
  0x7e   : > { %p2214_p7 = scmp.ne.s32.totalorder %s3185_s11, %s2213_s3  ;;  %p2220_p1 = scmp.lt.u32.totalorder %s2213_s3, %s3185_s11 }
  0x80   : > { %p2216_p9 = pnand %p2214_p7, %p2677_p8 }
  0x82   : > { %p2217_p4 = pneg %p2216_p9 }
  0x84   : > { %p2222_p3 = pnand %p2220_p1, %p2217_p4 }
  0x86   : > { %2225 = shalt.err (!%p2222_p3)
}
  0x87   : > { %s2226_s2 = scalar_lea.vmem %s604_s14, 16  ;;  %s2233_s16 = scalar_lea.vmem %s604_s14, 32 }
  0x88   : > { %p2227_p10 = scmp.ne.s32.totalorder %s604_s14, %s2226_s2  ;;  %p2234_p13 = scmp.lt.s32.totalorder %s604_s14, %s604_s14 }
  0x89   : > { %p2235_p0 = scmp.lt.s32.totalorder %s2233_s16, %s2226_s2 }
  0x8a   : > { %p2229_p11 = pnand %p2227_p10, %p2677_p8 }
  0x8b   : > { %p2236_p2 = por %p2235_p0, %p2234_p13 }
  0x8c   : > { %p2230_p12 = pneg %p2229_p11 }
  0x8e   : > { %p2237_p5 = pnand %p2236_p2, %p2230_p12 }
  0x90   : > { %2240 = shalt.err (!%p2237_p5)
}
  0x91   : > { %1996 = dma.hbm_to_vmem [thread:$0]  (!%p2661_p6), %s3185_s11, 16, %s604_s14, [#allocation21]  }
  0x92   : > { %s3186_s6 = sld [smem:[#allocation36_spill]] }
  0x98   : > { %s2241_s15 = scalar_lea.hbm %s3186_s6, 256 }
  0x99   : > { %p2242_p7 = scmp.ne.s32.totalorder %s3186_s6, %s2241_s15  ;;  %p2248_p1 = scmp.lt.u32.totalorder %s2241_s15, %s3186_s6 }
  0x9b   : > { %p2244_p9 = pnand %p2242_p7, %p2677_p8 }
  0x9d   : > { %p2245_p4 = pneg %p2244_p9 }
  0x9f   : > { %p2250_p3 = pnand %p2248_p1, %p2245_p4 }
  0xa1   : > { %2253 = shalt.err (!%p2250_p3)
}
  0xa2   : > { %s2254_s2 = scalar_lea.vmem %s544_s29, 256  ;;  %p2262_p13 = scmp.lt.s32.totalorder %s544_s29, %s544_s29 }
  0xa3   : > { %p2255_p10 = scmp.ne.s32.totalorder %s544_s29, %s2254_s2  ;;  %p2263_p0 = scmp.lt.s32.totalorder %s2254_s2, %s2254_s2 }
  0xa5   : > { %p2257_p11 = pnand %p2255_p10, %p2677_p8  ;;  %p2264_p2 = por %p2263_p0, %p2262_p13 }
  0xa7   : > { %p2258_p12 = pneg %p2257_p11 }
  0xa9   : > { %p2265_p5 = pnand %p2264_p2, %p2258_p12 }
  0xab   : > { %2268 = shalt.err (!%p2265_p5)
}
  0xac   : > { %s2496_s14 = smov 64   ;;  %s2497_s16 = smov 4  }
  0xad   : > { %1981 = dma.hbm_to_vmem [thread:$0]  (!%p2661_p6), %s3186_s6, 256, %s544_s29, [#allocation12], %s2496_s14, %s2496_s14, %s2497_s16  }
  0xae   : > { %s2498_s5 = smov [#allocation16]   ;;  %s2499_s15 = smov [#allocation19]  }
  0xaf   : > { %s567_s19 = sshll.u32 %s2498_s5, 4  ;;  %s592_s3 = sshll.u32 %s2499_s15, 4  ;;  %s568_s19 = int_to_ptr.vmem [resolvable:$true] %s567_s19  ;;  %s593_s3 = int_to_ptr.vmem [resolvable:$true] %s592_s3 }
  0xb0   : > { %s3187_s8 = sld [smem:[#allocation38_spill]] }
  0xb6   : > { %s2269_s12 = scalar_lea.hbm %s3187_s8, 256 }
  0xb7   : > { %p2270_p7 = scmp.ne.s32.totalorder %s3187_s8, %s2269_s12  ;;  %p2276_p1 = scmp.lt.u32.totalorder %s2269_s12, %s3187_s8 }
  0xb9   : > { %p2272_p9 = pnand %p2270_p7, %p2677_p8 }
  0xbb   : > { %p2273_p4 = pneg %p2272_p9 }
  0xbd   : > { %p2278_p3 = pnand %p2276_p1, %p2273_p4 }
  0xbf   : > { %2281 = shalt.err (!%p2278_p3)
}
  0xc0   : > { %s2282_s29 = scalar_lea.vmem %s568_s19, 256  ;;  %p2290_p13 = scmp.lt.s32.totalorder %s568_s19, %s568_s19 }
  0xc1   : > { %p2283_p10 = scmp.ne.s32.totalorder %s568_s19, %s2282_s29  ;;  %p2291_p0 = scmp.lt.s32.totalorder %s2282_s29, %s2282_s29 }
  0xc3   : > { %p2285_p11 = pnand %p2283_p10, %p2677_p8  ;;  %p2292_p2 = por %p2291_p0, %p2290_p13 }
  0xc5   : > { %p2286_p12 = pneg %p2285_p11 }
  0xc7   : > { %p2293_p5 = pnand %p2292_p2, %p2286_p12 }
  0xc9   : > { %2296 = shalt.err (!%p2293_p5)
}
  0xca   : > { %1987 = dma.hbm_to_vmem [thread:$0]  (!%p2661_p6), %s3187_s8, 256, %s568_s19, [#allocation15], %s2496_s14, %s2496_s14, %s2497_s16  }
  0xcb   : > { %s2297_s17 = scalar_lea.hbm %s3139_s10, 16 }
  0xcc   : > { %p2298_p7 = scmp.ne.s32.totalorder %s3139_s10, %s2297_s17  ;;  %p2304_p1 = scmp.lt.u32.totalorder %s2297_s17, %s3139_s10 }
  0xce   : > { %p2300_p9 = pnand %p2298_p7, %p2677_p8 }
  0xd0   : > { %p2301_p4 = pneg %p2300_p9 }
  0xd2   : > { %p2306_p3 = pnand %p2304_p1, %p2301_p4 }
  0xd4   : > { %2309 = shalt.err (!%p2306_p3)
}
  0xd5   : > { %s2310_s12 = scalar_lea.vmem %s593_s3, 16  ;;  %s2317_s14 = scalar_lea.vmem %s593_s3, 32 }
  0xd6   : > { %p2311_p10 = scmp.ne.s32.totalorder %s593_s3, %s2310_s12  ;;  %p2318_p13 = scmp.lt.s32.totalorder %s593_s3, %s593_s3 }
  0xd7   : > { %p2319_p0 = scmp.lt.s32.totalorder %s2317_s14, %s2310_s12 }
  0xd8   : > { %p2313_p11 = pnand %p2311_p10, %p2677_p8 }
  0xd9   : > { %p2320_p2 = por %p2319_p0, %p2318_p13 }
  0xda   : > { %p2314_p12 = pneg %p2313_p11 }
  0xdc   : > { %p2321_p5 = pnand %p2320_p2, %p2314_p12 }
  0xde   : > { %2324 = shalt.err (!%p2321_p5)
}
  0xdf   : > { %1993 = dma.hbm_to_vmem [thread:$0]  (!%p2661_p6), %s3139_s10, 16, %s593_s3, [#allocation18]  }
  0xe0   : > { %s2500_s2 = smov [#allocation22]   ;;  %s2325_s9 = scalar_lea.hbm %s3142_s13, 16 }
  0xe1   : > { %s623_s29 = sshll.u32 %s2500_s2, 4  ;;  %p2326_p7 = scmp.ne.s32.totalorder %s3142_s13, %s2325_s9  ;;  %s624_s29 = int_to_ptr.vmem [resolvable:$true] %s623_s29 }
  0xe2   : > { %p2332_p1 = scmp.lt.u32.totalorder %s2325_s9, %s3142_s13 }
  0xe3   : > { %p2328_p9 = pnand %p2326_p7, %p2677_p8 }
  0xe5   : > { %p2329_p4 = pneg %p2328_p9 }
  0xe7   : > { %p2334_p3 = pnand %p2332_p1, %p2329_p4 }
  0xe9   : > { %2337 = shalt.err (!%p2334_p3)
}
  0xea   : > { %s2338_s3 = scalar_lea.vmem %s624_s29, 16  ;;  %s2345_s27 = scalar_lea.vmem %s624_s29, 32 }
  0xeb   : > { %p2339_p10 = scmp.ne.s32.totalorder %s624_s29, %s2338_s3  ;;  %p2346_p13 = scmp.lt.s32.totalorder %s624_s29, %s624_s29 }
  0xec   : > { %p2347_p0 = scmp.lt.s32.totalorder %s2345_s27, %s2338_s3 }
  0xed   : > { %p2341_p11 = pnand %p2339_p10, %p2677_p8 }
  0xee   : > { %p2348_p2 = por %p2347_p0, %p2346_p13 }
  0xef   : > { %p2342_p12 = pneg %p2341_p11 }
  0xf1   : > { %p2349_p5 = pnand %p2348_p2, %p2342_p12 }
  0xf3   : > { %2352 = shalt.err (!%p2349_p5)
}
  0xf4   : > { %1999 = dma.hbm_to_vmem [thread:$0]  (!%p2661_p6), %s3142_s13, 16, %s624_s29, [#allocation21]  }
  0xf5   : > { %s1775_s26 = sadd.s32 4294967294, %s2485_s22   ;;  %s51_s14 = sadd.s32 1, %s2481_s1 }
  0xf6   : > { %p53_p8 = scmp.ge.s32.totalorder %s51_s14, 2  ;;  %s84_s28 = sadd.s32 1, %s2473_s20 }
  0xf7   : > { %p91_p7 = scmp.ne.s32.totalorder %s2473_s20, %s2469_s30  ;;  %p92_p9 = scmp.eq.s32.totalorder %s2485_s22, 0 }
  0xf8   : > { %s3218_s14 = smov (%p53_p8, %s51_s14), 0  ;;  %p97_p1 = scmp.ne.s32.totalorder %s2469_s30, %s2465_s0 }
  0xf9   : > { %p2839_p4 = por %p92_p9, %p91_p7  ;;  %s81_s19 = ssub.s32 %s2481_s1, %s3218_s14 }
  0xfa   : > { %s3189_s2 = sadd.s32 4294967295, %s2485_s22   ;;  %p82_p3 = scmp.eq.s32.totalorder %s81_s19, 0 }
  0xfb   : > { %p498_p6 = scmp.eq.s32.totalorder %s3189_s2, 1  ;;  %p3190_p10 = scmp.ne.s32.totalorder %s3178_s23, 0 }
  0xfc   : > { %p504_p13 = scmp.eq.s32.totalorder %s1775_s26, 1  ;;  %p2016_p2 = scmp.lt.s32.totalorder %s2485_s22, 2 }
  0xfd   : > { %p2851_p11 = por %p3190_p10, %p97_p1  ;;  %p2855_p12 = por %p498_p6, %p91_p7 }
  0xfe   : > { %s2860_s25 = scalar_select %p82_p3, %s2473_s20, %s84_s28  }
  0xff   : > { %s3192_s7 = scalar_select %p2855_p12, 1, 0 }
 0x100   : > { %p2862_p0 = por %p504_p13, %p97_p1  ;;  %s659_s11 = sand.u32 1, %s2473_s20  }
 0x101   : > { %s1788_s17 = sshll.u32 %s2481_s1, 4  ;;  %s3194_s3 = sld [smem:[#allocation31_spill]] }
 0x102   : > { %s3193_s9 = scalar_select %p2862_p0, 1, 0 }
 0x103   : > { %s662_s4 = scalar_lea.vmem [#allocation8], %s659_s11  ;;  %p2878_p5 = pnand %p2016_p2, %p2839_p4 }
 0x104   : > { %s669_s12 = sshll.u32 %s662_s4, 4  ;;  %s660_s28 = scalar_lea.sflag [#allocation9], %s659_s11  ;;  %s2874_s12 = int_to_ptr.vmem [resolvable:$true] %s669_s12 }
 0x105   : > { %p2355_p7 = pneg %p2878_p5 }
 0x107   : > { %s2872_s27 = scalar_lea.hbm %s3194_s3, %s1788_s17  ;;  %s2358_s5 = scalar_lea.hbm %s3194_s3, 32 }
 0x108   : > { %s2353_s19 = scalar_lea.hbm %s2872_s27, 16  ;;  %p2359_p4 = scmp.lt.u32.totalorder %s2872_s27, %s3194_s3 }
 0x109   : > { %p2354_p8 = scmp.ne.s32.totalorder %s2872_s27, %s2353_s19  ;;  %p2360_p6 = scmp.lt.u32.totalorder %s2358_s5, %s2353_s19 }
 0x10a   : > { %p2362_p10 = scmp.lt.u32.totalorder %s2353_s19, %s2872_s27 }
 0x10b   : > { %p2356_p9 = pnand %p2355_p7, %p2354_p8  ;;  %p2361_p3 = por %p2360_p6, %p2359_p4 }
 0x10d   : > { %p2357_p1 = pneg %p2356_p9  ;;  %p2363_p13 = por %p2362_p10, %p2361_p3 }
 0x10f   : > { %p2364_p2 = pnand %p2363_p13, %p2357_p1 }
 0x111   : > { %2367 = shalt.err (!%p2364_p2)
}
 0x112   : > { %s2368_s11 = scalar_lea.vmem %s2874_s12, 16  ;;  %s2501_s4 = smov [#allocation8]  }
 0x113   : > { %p2369_p8 = scmp.ne.s32.totalorder %s2874_s12, %s2368_s11  ;;  %s2373_s2 = sshll.u32 %s2501_s4, 4  ;;  %s2374_s2 = int_to_ptr.vmem [resolvable:$false] %s2373_s2 }
 0x114   : > { %s2375_s17 = scalar_lea.vmem %s2374_s2, 32  ;;  %p2376_p12 = scmp.lt.s32.totalorder %s2874_s12, %s2374_s2 }
 0x115   : > { %p2371_p9 = pnand %p2369_p8, %p2355_p7  ;;  %p2377_p4 = scmp.lt.s32.totalorder %s2375_s17, %s2368_s11 }
 0x117   : > { %p2372_p0 = pneg %p2371_p9  ;;  %p2378_p6 = por %p2377_p4, %p2376_p12 }
 0x119   : > { %p2379_p3 = pnand %p2378_p6, %p2372_p0 }
 0x11b   : > { %2382 = shalt.err (!%p2379_p3)
}
 0x11c   : > { %2003 = dma.hbm_to_vmem [thread:$0]  (!%p2878_p5), %s2872_s27, 16, %s2874_s12, %s660_s28  }
 0x11d   : > { %p3196_p1 = scmp.ne.s32.totalorder %s3179_s24, 0 }
 0x11e   : > { %s2910_s19 = sand.u32 (!%p3196_p1), 1, %s2469_s30  }
 0x11f   : > { %685 = sbr.rel (%p3196_p1) target bundleno = 2891 (0xb4b), region = 96  ;;  %s688_s5 = scalar_lea.sflag (!%p3196_p1), [#allocation9], %s2910_s19 }
 0x120   : > { %s690_s16 = scalar_lea.vmem (!%p3196_p1), [#allocation8], %s2910_s19 }
 0x126   : > { %2440 = dma.done.wait (%p2851_p11), %s688_s5, 16  }
 0x127   : > { %2442 = vsyncadd (%p2851_p11), %s688_s5, 4294967280  ;;  %p3197_p12 = scmp.ne.s32.totalorder %s3178_s23, 0 }
 0x129   : > { %2444 = dma.done.wait (%p3197_p12), [#allocation12], 272  }
 0x12a   : > { %2446 = vsyncadd (%p3197_p12), [#allocation12], 4294967024 }
 0x12b   : > { %2448 = dma.done.wait (%p3197_p12), [#allocation15], 272  }
 0x12c   : > { %2450 = vsyncadd (%p3197_p12), [#allocation15], 4294967024 }
 0x12d   : > { %2452 = dma.done.wait (%p3197_p12), [#allocation18], 32  }
 0x12e   : > { %2454 = vsyncadd (%p3197_p12), [#allocation18], 4294967264 }
 0x12f   : > { %2456 = dma.done.wait (%p3197_p12), [#allocation21], 32  }
 0x130   : > { %2458 = vsyncadd (%p3197_p12), [#allocation21], 4294967264  ;;  %p793_p11 = scmp.lt.s32.totalorder %s2477_s21, 1  ;;  %v2502_v0 = vmov 0.0   ;;  %vm2503_vm0 = vmmov 0   ;;  %s3198_s11 = sld [smem:[#allocation32_spill]] }
 0x131   : > { %1875 = vmatprep.subr.bf16.mxu0 %v2502_v0  ;;  %1883 = vmatprep.subr.bf16.mxu1 %v2502_v0  ;;  %v2948_v1 = vld [vmem:[%s690_s16] ss:$0 sm:$0xff]  ;;  %s3199_s17 = sld [smem:[#allocation30_spill]]  ;;  %s3200_s6 = sld [smem:[#allocation34_spill]]  ;;  %vm848_vm1 = vcmask 261120   ;;  %v2106_v8 = vld [vmem:[#allocation13] sm:$0xff]  }
 0x132   : > { %1879 = vmatprep.mubr.msk.bf16.mxu0 %vm2503_vm0, %v2502_v0  ;;  %1887 = vmatprep.mubr.msk.bf16.mxu1 %vm2503_vm0, %v2502_v0  ;;  %s794_s29 = scalar_select %p793_p11, %s2477_s21, 1  ;;  %v2107_v9 = vld [vmem:[#allocation13 + $0x8] sm:$0xff]   ;;  %v1806_v11 = vld [vmem:[#allocation11] ss:$0 sm:$0xff]  ;;  %vm1022_vm2 = vcmask 60416  }
 0x133   : > { %s3201_s24 = sld [smem:[#allocation33_spill]]  ;;  %v1810_v25 = vld [vmem:[#allocation14] ss:$0 sm:$0xff]  ;;  %s2505_s12 = smov 112  }
 0x134   : > { %s1799_s23 = sshll.u32 %s794_s29, 3  ;;  %s2506_s28 = smov 104  }
 0x135   : > { %s2946_s26 = scalar_lea.vmem %s3147_s18, %s1799_s23  ;;  %s3202_s15 = sshll.u32 %s2910_s19, 3 }
 0x136   : > { %v2102_v2 = vld [vmem:[%s3198_s11] sm:$0xff]   ;;  %v2104_v4 = vld [vmem:[%s3198_s11 + $0x8] sm:$0xff]   ;;  %s2995_s4 = scalar_lea.vmem [#allocation23], %s3202_s15  ;;  %s2997_s2 = smov 0  }
 0x137   : > { %s796_s5 = scalar_lea.vmem %s3199_s17, %s1799_s23  ;;  %v2103_v3 = vld [vmem:[%s3200_s6] sm:$0xff]   ;;  %1876 = vmatpush3.bf16.msra.mxu0 %v2102_v2  ;;  %v2105_v5 = vld [vmem:[%s3200_s6 + $0x8] sm:$0xff]   ;;  %s2504_s23 = smov 120  }
 0x138   : > { %1884 = vmatpush3.bf16.msra.mxu1 %v2103_v3  ;;  %1877 = vmatprep.subr.bf16.mxu0 %v2502_v0  ;;  %v2966_v6 = vld [vmem:[%s796_s5] sm:$0xff] }
 0x139   : > { %1885 = vmatprep.subr.bf16.mxu1 %v2502_v0  ;;  %v817_v7 = vpack.c.bf16 %v2966_v6, %v2966_v6  ;;  %v1802_v10 = vld [vmem:[%s3201_s24] ss:$0 sm:$0xff] }
 0x13b   : > { %1878 = vmatpush3.bf16.msra.mxu0 %v2104_v4 }
 0x13c   : > { %1886 = vmatpush3.bf16.msra.mxu1 %v2105_v5  ;;  %1891 = vmatprep.subr.bf16.mxu0 %v2502_v0 }
 0x13e   : > { %1880 = vmatmul.mubr.msk.bf16.vlgmr.msra.gmra.mrb[0].mxu0 %vm848_vm1, %v817_v7 }
 0x13f   : > { %1888 = vmatmul.mubr.msk.bf16.vlgmr.msra.gmra.mrb[0].mxu1 %vm848_vm1, %v817_v7  ;;  %1892 = vmatpush3.bf16.msra.mxu0 %v2106_v8 }
 0x140   : > { %1893 = vmatprep.subr.bf16.mxu0 %v2502_v0  ;;  %1895 = vmatprep.mubr.msk.bf16.mxu0 %vm2503_vm0, %v2502_v0 }
 0x143   : > { %1894 = vmatpush3.bf16.msra.mxu0 %v2107_v9 }
 0x146   : > { %1896 = vmatmul.mubr.msk.bf16.vlgmr.msra.gmra.mrb[4].mxu0 %vm848_vm1, %v817_v7 }
 0x211   : > { %v886_v12 = vpop.f32.mrb[0].mxu0 }
 0x212   : > { %v887_v13 = vadd.f32 %v1802_v10, %v886_v12  ;;  %v951_v14 = vpop.f32.mrb[0].mxu1  ;;  %v1881_v15 = vpop.f32.mrb[1].mxu0 }
 0x213   : > { %v952_v16 = vadd.f32 %v1806_v11, %v951_v14  ;;  %v1889_v17 = vpop.f32.mrb[1].mxu1  ;;  %v889_v18 = vpop.f32.mrb[2].mxu0 }
 0x214   : > { %v892_v19 = vmul.f32 0.35355338, %v887_v13  ;;  %v954_v20 = vpop.f32.mrb[2].mxu1  ;;  %v1882_v21 = vpop.f32.mrb[3].mxu0 }
 0x215   : > { %v957_v22 = vpack.c.bf16 %v952_v16, %v952_v16  ;;  %v1890_v23 = vpop.f32.mrb[3].mxu1 }
 0x216   : > { %v893_v24 = vpack.c.bf16 %v892_v19, %v892_v19 }
 0x217   : > { %1024 = vst.msk [vmem:[#allocation3] sm:$0xf] %vm1022_vm2, %v957_v22  ;;  %1037 = vrot.lane.b32.xlu0 %v957_v22, %s2504_s23 }
 0x218   : > { %1023 = vst.msk [vmem:[#allocation2] sm:$0xf] %vm1022_vm2, %v893_v24  ;;  %1050 = vrot.lane.b32.xlu1 %v893_v24, %s2505_s12 }
 0x219   : > { %v1015_v26 = vpop.f32.mrb[4].mxu0 }
 0x21a   : > { %v1016_v27 = vadd.f32 %v1810_v25, %v1015_v26  ;;  %v1897_v28 = vpop.f32.mrb[5].mxu0 }
 0x21b   : > { %1055 = vrot.lane.b32.xlu0 %v957_v22, %s2505_s12  ;;  %v1018_v29 = vpop.f32.mrb[6].mxu0 }
 0x21c   : > { %v1021_v30 = vpack.c.bf16 %v1016_v27, %v1016_v27  ;;  %v1898_v31 = vpop.f32.mrb[7].mxu0 }
 0x21e   : > { %1025 = vst.msk [vmem:[#allocation4] sm:$0xf] %vm1022_vm2, %v1021_v30  ;;  %1045 = vrot.lane.b32.xlu1 %v1021_v30, %s2504_s23 }
 0x21f   : > { %1029 = vrot.lane.b32.xlu0 %v893_v24, %s2504_s23 }
 0x222   : > { %1060 = vrot.lane.b32.xlu1 %v1021_v30, %s2505_s12 }
 0x223   : > { %1065 = vrot.lane.b32.xlu0 %v893_v24, %s2506_s28 }
 0x226   : > { %1070 = vrot.lane.b32.xlu1 %v957_v22, %s2506_s28 }
 0x227   : > { %1075 = vrot.lane.b32.xlu0 %v1021_v30, %s2506_s28 }
 0x289   : > { %v1038_v32 = vpop.permute.xlu0 %1037 }
 0x28a   : > { %1041 = vst.msk [vmem:[#allocation3 + $0x4] sm:$0xf] %vm1022_vm2, %v1038_v32  ;;  %v1051_v33 = vpop.permute.xlu1 %1050 }
 0x28b   : > { %1054 = vst.msk [vmem:[#allocation2 + $0x8] sm:$0xf] %vm1022_vm2, %v1051_v33 }
 0x28d   : > { %v1056_v34 = vpop.permute.xlu0 %1055 }
 0x28e   : > { %1059 = vst.msk [vmem:[#allocation3 + $0x8] sm:$0xf] %vm1022_vm2, %v1056_v34 }
 0x290   : > { %v1046_v35 = vpop.permute.xlu1 %1045 }
 0x291   : > { %v1030_v36 = vpop.permute.xlu0 %1029  ;;  %1049 = vst.msk [vmem:[#allocation4 + $0x4] sm:$0xf] %vm1022_vm2, %v1046_v35 }
 0x292   : > { %1033 = vst.msk [vmem:[#allocation2 + $0x4] sm:$0xf] %vm1022_vm2, %v1030_v36 }
 0x294   : > { %v1061_v37 = vpop.permute.xlu1 %1060 }
 0x295   : > { %v1066_v38 = vpop.permute.xlu0 %1065  ;;  %1064 = vst.msk [vmem:[#allocation4 + $0x8] sm:$0xf] %vm1022_vm2, %v1061_v37 }
 0x296   : > { %1069 = vst.msk [vmem:[#allocation2 + $0xc] sm:$0xf] %vm1022_vm2, %v1066_v38 }
 0x298   : > { %v1071_v39 = vpop.permute.xlu1 %1070 }
 0x299   : > { %v1076_v40 = vpop.permute.xlu0 %1075  ;;  %1074 = vst.msk [vmem:[#allocation3 + $0xc] sm:$0xf] %vm1022_vm2, %v1071_v39 }
 0x29a   : > { %1079 = vst.msk [vmem:[#allocation4 + $0xc] sm:$0xf] %vm1022_vm2, %v1076_v40 }
 0x29b LB: >> { %v2507_v41 = vmov 0.0   ;;  %vm2508_vm3 = vmmov 0   ;;  %s3003_s17 = sshll.u32 %s2489_s2, 2  ;;  %vm1095_vm4 = vcmask 64512   ;;  %vm1157_vm5 = vcmask 1043456   ;;  %s1085_s2 = sadd.s32 1, %s2489_s2   ;;  %s2489_s2 = sphi %s2997_s2, %s1085_s2  }
 0x29c   : >> { %1899 = vmatprep.subr.bf16.mxu0 %v2507_v41  ;;  %1901 = vmatprep.mubr.msk.bf16.mxu0 %vm2508_vm3, %v2507_v41  ;;  %s1090_s5 = scalar_lea.vmem [#allocation3], %s3003_s17  ;;  %s1087_s29 = scalar_lea.vmem [#allocation2], %s3003_s17 }
 0x29d   : >> { %1905 = vmatprep.subr.bf16.mxu1 %v2507_v41  ;;  %1907 = vmatprep.mubr.msk.bf16.mxu1 %vm2508_vm3, %v2507_v41  ;;  %v1088_v44 = vld [vmem:[%s1087_s29] sm:$0xf]  ;;  %s1093_s16 = scalar_lea.vmem [#allocation4], %s3003_s17  ;;  %s1203_s27 = scalar_lea.vmem [#allocation5], %s3003_s17 }
 0x29e   : >> { %p1082_p0 = scmp.ge.s32.totalorder %s1085_s2, 4  }
 0x29f   : > { %1334 = vst.msk [vmem:[#allocation7] sm:$0xff] (%p1082_p0), %vm848_vm1, %v2502_v0  ;;  %s2509_s8 = smov (%p1082_p0), 8   ;;  %v2115_v9 = vld [vmem:[#allocation16] sm:$0xff] (%p1082_p0)   ;;  %s2510_s3 = smov (%p1082_p0), 24   ;;  %vm1231_vm6 = vcmask (%p1082_p0), 130048   ;;  %vm1234_vm7 = vcmask (%p1082_p0), 195584  }
 0x2a0   : >> { %v1091_v42 = vld [vmem:[%s1090_s5] sm:$0xf]  ;;  %s2511_s24 = smov (%p1082_p0), 16   ;;  %v1826_v17 = vld [vmem:[#allocation17] ss:$0 sm:$0xff] (%p1082_p0)  ;;  %s3203_s28 = sld [smem:[#allocation41_spill]] (%p1082_p0) }
 0x2a1   : >> { %v1100_v43 = vsel %vm1095_vm4, %v1091_v42, 0  ;;  %v1094_v56 = vld [vmem:[%s1093_s16] sm:$0xf]  ;;  %v1830_v35 = vld [vmem:[#allocation19] ss:$0 sm:$0xff] (%p1082_p0)  ;;  %s3204_s29 = sld [smem:[#allocation42_spill]] (%p1082_p0) }
 0x2a2   : >> { %1900 = vmatpush3.bf16.xpose.msra.mxu0 %v1100_v43  ;;  %v1159_v57 = vsel %vm1157_vm5, %v1094_v56, 0  ;;  %v1831_v37 = vld [vmem:[#allocation20] ss:$0 sm:$0xff] (%p1082_p0)  ;;  %vm1447_vm8 = vcmask (%p1082_p0), 523264   ;;  %s3205_s2 = sld [smem:[#allocation43_spill]] (%p1082_p0)  ;;  %s3206_s5 = sld [smem:[#allocation44_spill]] (%p1082_p0) }
 0x2a3   : >> { %1906 = vmatpush3.bf16.msra.mxu1 %v1159_v57  ;;  %1927 = vmatprep.subr.bf16.mxu0 (%p1082_p0), %v2502_v0  ;;  %s3208_s15 = sld [smem:[#allocation46_spill]] (%p1082_p0)  ;;  %p3209_p7 = scmp.ne.s32.totalorder (%p1082_p0), %s3192_s7, 0 }
 0x2a4   : > { %1911 = vmatprep.subr.bf16.mxu1 (%p1082_p0), %v2502_v0 }
 0x2a6   : > { %v2117_v30 = vld [vmem:[%s3203_s28] sm:$0xff] (%p1082_p0)  }
 0x2a7   : > { %v2119_v42 = vld [vmem:[%s3204_s29] sm:$0xff] (%p1082_p0)   ;;  %v2120_v43 = vld [vmem:[%s3204_s29 + $0x8] sm:$0xff] (%p1082_p0)  }
 0x2a9   : >> { %1902 = vmatmul.mubr.msk.bf16.vlgmr.msra.gmra.mrb[0].mxu0 %vm1095_vm4, %v1088_v44  ;;  %v2121_v44 = vld [vmem:[%s3204_s29 + $0x10] sm:$0xff] (%p1082_p0)  }
 0x2aa   : > { %1935 = vmatprep.mubr.msk.bf16.mxu0 (%p1082_p0), %vm2503_vm0, %v2502_v0  ;;  %1928 = vmatpush3.bf16.msra.mxu0 (%p1082_p0), %v2119_v42 }
 0x2ab   : > { %1929 = vmatprep.subr.bf16.mxu0 (%p1082_p0), %v2502_v0 }
 0x2ae   : > { %1930 = vmatpush3.bf16.msra.mxu0 (%p1082_p0), %v2120_v43 }
 0x2af   : > { %1931 = vmatprep.subr.bf16.mxu0 (%p1082_p0), %v2502_v0 }
 0x2b2   : > { %1932 = vmatpush3.bf16.msra.mxu0 (%p1082_p0), %v2121_v44 }
 0x2b3   : > { %1933 = vmatprep.subr.bf16.mxu0 (%p1082_p0), %v2502_v0 }
 0x37c   : >> { %v1136_v45 = vpop.f32.mrb[0].mxu0 }
 0x37d   : >> { %v1137_v46 = vadd.f32 %v2948_v1, %v1136_v45  ;;  %v1903_v47 = vpop.f32.mrb[1].mxu0  ;;  %v2116_v1 = vld [vmem:[#allocation16 + $0x8] sm:$0xff] (%p1082_p0)   ;;  %v2122_v45 = vld [vmem:[%s3204_s29 + $0x18] sm:$0xff] (%p1082_p0)  }
 0x37e   : >> { %v1139_v48 = vpop.f32.mrb[2].mxu0  ;;  %1934 = vmatpush3.bf16.msra.mxu0 (%p1082_p0), %v2122_v45 }
 0x37f   : >> { %v1904_v49 = vpop.f32.mrb[3].mxu0  ;;  %v1142_v50 = vsel %vm1095_vm4, %v1137_v46, -inf }
 0x380   : >> { %1143 = vmax.xlane.f32.xlu0 %v1142_v50 }
 0x40d   : >> { %v1144_v51 = vpop.xlane.xlu0 %1143 }
 0x40e   : >> { %v1145_v52 = vsub.f32 %v1137_v46, %v1144_v51  ;;  %v1832_v46 = vld [vmem:[#allocation22] ss:$0 sm:$0xff] (%p1082_p0) }
 0x410   : >> { %v1146_v53 = vmul.f32 1.442695, %v1145_v52 }
 0x412   : >> { %2108 = vpow2.f32 %v1146_v53 }
 0x41c   : >> { %v2109_v54 = vpop.eup %2108 }
 0x41d   : >> { %v1148_v55 = vsel %vm1095_vm4, %v2109_v54, 0.0 }
 0x41e   : >> { %1149 = vadd.xlane.f32.xlu0 %v1148_v55 }
 0x4ab   : >> { %v1150_v58 = vpop.xlane.xlu0 %1149 }
 0x4ac   : >> { %2110 = vrcp.f32 %v1150_v58 }
 0x4b6   : >> { %v2111_v59 = vpop.eup %2110 }
 0x4b7   : >> { %v1152_v60 = vmul.f32 %v2111_v59, %v2109_v54 }
 0x4b9   : >> { %v1153_v61 = vpack.c.bf16 %v1152_v60, %v1152_v60 }
 0x4bb   : >> { %1908 = vmatmul.mubr.msk.bf16.vlgmr.msra.gmra.mrb[0].mxu1 %vm1095_vm4, %v1153_v61  ;;  %v1413_v61 = vld [vmem:[#allocation7] sm:$0xff] (%p1082_p0) }
 0x4bc   : > { %1915 = vmatprep.mubr.msk.bf16.mxu1 (%p1082_p0), %vm2503_vm0, %v2502_v0  ;;  %1912 = vmatpush3.bf16.msra.mxu1 (%p1082_p0), %v2115_v9 }
 0x4bd   : > { %1913 = vmatprep.subr.bf16.mxu1 (%p1082_p0), %v2502_v0 }
 0x4c0   : > { %1914 = vmatpush3.bf16.msra.mxu1 (%p1082_p0), %v2116_v1 }
 0x4c1   : > { %1919 = vmatprep.subr.bf16.mxu1 (%p1082_p0), %v2502_v0 }
 0x58b   : > { %1084 = sbr.rel (!%p1082_p0) target bundleno = 667 (0x29b), region = 217 }
 0x58e   : >> { %v1195_v62 = vpop.f32.mrb[0].mxu1 }
 0x58f   : >> { %v1201_v63 = vpack.c.bf16 %v1195_v62, %v1195_v62  ;;  %v1909_v2 = vpop.f32.mrb[1].mxu1 }
 0x590   : >> { %v1198_v3 = vpop.f32.mrb[2].mxu1 }
 0x591   : >> { %1204 = vst.msk [vmem:[%s1203_s27] sm:$0xf] %vm1022_vm2, %v1201_v63  ;;  %v1910_v4 = vpop.f32.mrb[3].mxu1 }
 0x598   : > { %v2112_v5 = vld [vmem:[#allocation5 + $0x4] ss:$0 sps:$4 sm:$0xff]   ;;  %v2113_v7 = vld [vmem:[#allocation5 + $0x8] ss:$0 sps:$4 sm:$0xff]   ;;  %v2114_v8 = vld [vmem:[#allocation5 + $0xc] ss:$0 sps:$4 sm:$0xff]  }
 0x599   : > { %1215 = vrot.lane.b32.xlu0 %v2112_v5, %s2509_s8  ;;  %1225 = vrot.lane.b32.xlu1 %v2114_v8, %s2510_s3  ;;  %v1205_v11 = vld [vmem:[#allocation5] sm:$0xf]  ;;  %v1841_v5 = vld [vmem:[%s3205_s2] ss:$0 sm:$0xff]  ;;  %s3207_s8 = sld [smem:[#allocation45_spill]]  ;;  %s1845_s3 = sshll.u32 %s2477_s21, 7 }
 0x59a   : > { %v1505_v8 = vld [vmem:[%s2946_s26] sm:$0xff]  ;;  %s3078_s2 = scalar_lea.hbm %s3208_s15, %s1845_s3  ;;  %s1541_s26 = scalar_lea.sflag [#allocation10], %s2910_s19 }
 0x59b   : > { %s2512_s21 = smov [#allocation23]  }
 0x59d   : > { %1220 = vrot.lane.b32.xlu0 %v2113_v7, %s2511_s24  ;;  %s1554_s24 = sshll.u32 %s2995_s4, 4  ;;  %s3080_s24 = int_to_ptr.vmem [resolvable:$true] %s1554_s24 }
 0x59e   : > { %s2383_s17 = scalar_lea.vmem %s3080_s24, 128 }
 0x59f   : > { %p2384_p5 = scmp.ne.s32.totalorder %s3080_s24, %s2383_s17 }
 0x5a1   : > { %p2385_p10 = pnand %p2384_p5, %p3209_p7 }
 0x5a3   : > { %p2386_p13 = pneg %p2385_p10 }
 0x60b   : > { %v1216_v10 = vpop.permute.xlu0 %1215  ;;  %v1226_v12 = vpop.permute.xlu1 %1225 }
 0x60c   : > { %v1230_v13 = vsel %vm1095_vm4, %v1205_v11, %v1216_v10 }
 0x60f   : > { %v1221_v14 = vpop.permute.xlu0 %1220 }
 0x610   : > { %v1233_v15 = vsel %vm1231_vm6, %v1230_v13, %v1221_v14 }
 0x611   : > { %v1236_v16 = vsel %vm1234_vm7, %v1233_v15, %v1226_v12 }
 0x612   : > { %1916 = vmatmul.mubr.msk.bf16.vlgmr.msra.gmra.mrb[0].mxu1 %vm848_vm1, %v1236_v16 }
 0x613   : > { %1923 = vmatprep.mubr.msk.bf16.mxu1 %vm2503_vm0, %v2502_v0  ;;  %1920 = vmatpush3.bf16.msra.mxu1 %v2117_v30 }
 0x614   : > { %1921 = vmatprep.subr.bf16.mxu1 %v2502_v0 }
 0x6e5   : > { %v1296_v18 = vpop.f32.mrb[0].mxu1 }
 0x6e6   : > { %v1297_v19 = vadd.f32 %v1826_v17, %v1296_v18  ;;  %v1917_v20 = vpop.f32.mrb[1].mxu1 }
 0x6e7   : > { %v1299_v21 = vpop.f32.mrb[2].mxu1 }
 0x6e8   : > { %v1302_v22 = vadd.f32 %v1297_v19, %v2966_v6  ;;  %v1918_v23 = vpop.f32.mrb[3].mxu1  ;;  %v2118_v6 = vld [vmem:[%s3203_s28 + $0x8] sm:$0xff]   ;;  %v1842_v21 = vld [vmem:[%s3206_s5] ss:$0 sm:$0xff]  ;;  %s2387_s5 = sshll.u32 %s2512_s21, 4  ;;  %s2388_s5 = int_to_ptr.vmem [resolvable:$false] %s2387_s5 }
 0x6e9   : > { %1922 = vmatpush3.bf16.msra.mxu1 %v2118_v6  ;;  %v1843_v23 = vld [vmem:[%s3207_s8] ss:$0 sm:$0xff]  ;;  %s2389_s16 = scalar_lea.vmem %s2388_s5, 256  ;;  %p2390_p2 = scmp.lt.s32.totalorder %s3080_s24, %s2388_s5 }
 0x6ea   : > { %v1305_v24 = vsel %vm848_vm1, %v1302_v22, 0.0  ;;  %p2391_p8 = scmp.lt.s32.totalorder %s2389_s16, %s2383_s17 }
 0x6eb   : > { %1306 = vadd.xlane.f32.xlu1 %v1305_v24 }
 0x6ec   : > { %p2392_p9 = por %p2391_p8, %p2390_p2 }
 0x6ee   : > { %p2393_p4 = pnand %p2392_p9, %p2386_p13 }
 0x778   : > { %v1307_v25 = vpop.xlane.xlu1 %1306 }
 0x779   : > { %v1309_v26 = vmul.f32 0.03125, %v1307_v25 }
 0x77b   : > { %v1310_v27 = vsub.f32 %v1302_v22, %v1309_v26 }
 0x77d   : > { %v1311_v28 = vmul.f32 %v1310_v27, %v1310_v27 }
 0x77f   : > { %v1312_v29 = vsel %vm848_vm1, %v1311_v28, 0.0 }
 0x780   : > { %1313 = vadd.xlane.f32.xlu0 %v1312_v29 }
 0x80d   : > { %v1314_v31 = vpop.xlane.xlu0 %1313 }
 0x80e   : > { %v1315_v32 = vmul.f32 0.03125, %v1314_v31 }
 0x810   : > { %v1316_v33 = vadd.f32 1e-12, %v1315_v32 }
 0x812   : > { %2123 = vrsqrt.f32 %v1316_v33 }
 0x81c   : > { %v2124_v34 = vpop.eup %2123 }
 0x81d   : > { %v1318_v36 = vmul.f32 %v2124_v34, %v1310_v27 }
 0x81f   : > { %v1325_v38 = vmul.f32 %v1830_v35, %v1318_v36 }
 0x821   : > { %v1332_v39 = vadd.f32 %v1831_v37, %v1325_v38 }
 0x823   : > { %1333 = vst.msk [vmem:[#allocation6] sm:$0xff] %vm848_vm1, %v1332_v39 }
 0x82a   : > { %v1335_v40 = vld [vmem:[#allocation6] sm:$0xff] }
 0x82b   : > { %v1336_v41 = vpack.c.bf16 %v1335_v40, %v1335_v40 }
 0x82d   : > { %1924 = vmatmul.mubr.msk.bf16.vlgmr.msra.gmra.mrb[4].mxu1 %vm848_vm1, %v1336_v41 }
 0x900   : > { %v1398_v47 = vpop.f32.mrb[4].mxu1 }
 0x901   : > { %v1399_v48 = vadd.f32 %v1832_v46, %v1398_v47  ;;  %v1925_v49 = vpop.f32.mrb[5].mxu1 }
 0x902   : > { %v1401_v50 = vpop.f32.mrb[6].mxu1 }
 0x903   : > { %v1404_v51 = vmul.f32 %v1399_v48, %v1399_v48  ;;  %v1926_v52 = vpop.f32.mrb[7].mxu1 }
 0x905   : > { %v1405_v53 = vmul.f32 %v1404_v51, %v1399_v48 }
 0x907   : > { %v1406_v54 = vmul.f32 0.044715, %v1405_v53 }
 0x909   : > { %v1407_v55 = vadd.f32 %v1406_v54, %v1399_v48 }
 0x90b   : > { %v1408_v56 = vmul.f32 0.7978846, %v1407_v55 }
 0x90d   : > { %2125 = vtanh.f32 %v1408_v56 }
 0x917   : > { %v2126_v57 = vpop.eup %2125 }
 0x918   : > { %v1410_v58 = vadd.f32 1.0, %v2126_v57 }
 0x91a   : > { %v1411_v59 = vmul.f32 0.5, %v1410_v58 }
 0x91c   : > { %v1412_v60 = vmul.f32 %v1411_v59, %v1399_v48 }
 0x91e   : > { %v1414_v0 = vpack.c.bf16 %v1412_v60, %v1412_v60 }
 0x920   : > { %1936 = vmatmul.mubr.msk.bf16.vlgmr.msra.gmra.mrb[0].mxu0 %vm1447_vm8, %v1414_v0 }
 0x9f3   : > { %v1485_v62 = vpop.f32.mrb[0].mxu0 }
 0x9f4   : > { %v1491_v63 = vadd.f32 %v1485_v62, %v1413_v61  ;;  %v1937_v2 = vpop.f32.mrb[1].mxu0 }
 0x9f5   : > { %v1488_v3 = vpop.f32.mrb[2].mxu0 }
 0x9f6   : > { %1492 = vst.msk [vmem:[#allocation7] sm:$0xff] %vm848_vm1, %v1491_v63  ;;  %v1938_v4 = vpop.f32.mrb[3].mxu0 }
 0x9fd   : > { %v1496_v7 = vld [vmem:[#allocation7] sm:$0xff] }
 0x9fe   : > { %v1504_v9 = vadd.f32 %v1841_v5, %v1496_v7 }
 0xa00   : > { %v1506_v1 = vmul.f32 %v1505_v8, %v1504_v9 }
 0xa02   : > { %v1508_v10 = vadd.f32 %v1506_v1, %v1335_v40 }
 0xa04   : > { %v1511_v11 = vsel %vm848_vm1, %v1508_v10, 0.0 }
 0xa05   : > { %1512 = vadd.xlane.f32.xlu0 %v1511_v11 }
 0xa92   : > { %v1513_v12 = vpop.xlane.xlu0 %1512 }
 0xa93   : > { %v1515_v13 = vmul.f32 0.03125, %v1513_v12 }
 0xa95   : > { %v1516_v14 = vsub.f32 %v1508_v10, %v1515_v13 }
 0xa97   : > { %v1517_v15 = vmul.f32 %v1516_v14, %v1516_v14 }
 0xa99   : > { %v1518_v16 = vsel %vm848_vm1, %v1517_v15, 0.0 }
 0xa9a   : > { %1519 = vadd.xlane.f32.xlu1 %v1518_v16 }
 0xb27   : > { %v1520_v17 = vpop.xlane.xlu1 %1519 }
 0xb28   : > { %v1521_v18 = vmul.f32 0.03125, %v1520_v17 }
 0xb2a   : > { %v1522_v19 = vadd.f32 1e-12, %v1521_v18 }
 0xb2c   : > { %2127 = vrsqrt.f32 %v1522_v19 }
 0xb36   : > { %v2128_v20 = vpop.eup %2127 }
 0xb37   : > { %v1524_v22 = vmul.f32 %v2128_v20, %v1516_v14 }
 0xb39   : > { %v1531_v24 = vmul.f32 %v1842_v21, %v1524_v22 }
 0xb3b   : > { %v1538_v25 = vadd.f32 %v1843_v23, %v1531_v24 }
 0xb3d   : > { %1539 = vst.msk [vmem:[%s2995_s4] sm:$0xff] %vm848_vm1, %v1538_v25 }
 0xb3e   : > { %2396 = shalt.err (!%p2393_p4)
}
 0xb3f   : > { %s2397_s19 = scalar_lea.hbm %s3078_s2, 128  ;;  %s2401_s8 = scalar_lea.hbm %s3208_s15, 256 }
 0xb40   : > { %p2398_p6 = scmp.ne.s32.totalorder %s3078_s2, %s2397_s19  ;;  %p2402_p12 = scmp.lt.u32.totalorder %s3078_s2, %s3208_s15 }
 0xb41   : > { %p2403_p11 = scmp.lt.u32.totalorder %s2401_s8, %s2397_s19  ;;  %p2405_p5 = scmp.lt.u32.totalorder %s2397_s19, %s3078_s2 }
 0xb42   : > { %p2399_p3 = pnand %p2398_p6, %p3209_p7 }
 0xb43   : > { %p2404_p0 = por %p2403_p11, %p2402_p12 }
 0xb44   : > { %p2400_p1 = pneg %p2399_p3 }
 0xb45   : > { %p2406_p10 = por %p2405_p5, %p2404_p0 }
 0xb47   : > { %p2407_p13 = pnand %p2406_p10, %p2400_p1 }
 0xb49   : > { %2410 = shalt.err (!%p2407_p13)
}
 0xb4a   : > { %1973 = dma.vmem_to_hbm [thread:$0]  (%p3209_p7), %s3080_s24, 128, %s3078_s2, %s1541_s26  }
 0xb4b PF: > { %s1566_s12 = sand.u32 1, %s2465_s0   ;;  %p3210_p2 = scmp.ne.s32.totalorder %s3193_s9, 0 }
 0xb4c   : > { %p3211_p8 = scmp.ge.s32.totalorder %s2485_s22, 2  ;;  %s1567_s17 = scalar_lea.sflag [#allocation10], %s1566_s12 }
 0xb4e   : > { %p2005_p9 = pnand %p3211_p8, %p3210_p2 }
 0xb50   : > { %2460 = dma.done.wait (!%p2005_p9), %s1567_s17, 128  }
 0xb51   : > { %2462 = vsyncadd (!%p2005_p9), %s1567_s17, 4294967168  ;;  %s39_s22 = sadd.s32 1, %s2485_s22   ;;  %s3212_s0 = smov %s2469_s30 }
 0xb52   : > { %p36_p4 = scmp.ge.s32.totalorder %s39_s22, 4   ;;  %s3213_s30 = smov %s2473_s20 }
 0xb53   : > { %s3214_s20 = smov %s2860_s25  ;;  %s3215_s21 = smov %s2481_s1 }
 0xb54   : > { %s3216_s1 = smov %s3218_s14  ;;  %38 = sbr.rel (!%p36_p4) target bundleno = 28 (0x1c), region = 228 }
 0xb5b   :  { %1572 = vsyncpa [#allocation9], 1 }
 0xb5c   :  { %1574 = vsyncpa [#allocation9 + $0x1], 1 }
 0xb5d   :  { %1575 = vsyncpa [#allocation12], 1 }
 0xb5e   :  { %1576 = vsyncpa [#allocation15], 1 }
 0xb5f   :  { %1577 = vsyncpa [#allocation18], 1 }
 0xb60   :  { %1578 = vsyncpa [#allocation21], 1 }
 0xb61   :  { %1579 = vsyncpa [#allocation10], 1 }
 0xb62   :  { %1581 = vsyncpa [#allocation10 + $0x1], 1 }

</bundles_post_ra>
